<compile_context>
chip_gen: v7x
topology: tpu7x:2x2x1
jax: 0.10.0
libtpu: 0.0.40
codegen_flags: <defaults>
</compile_context>

<pallas_src>
import functools

import jax
import jax.numpy as jnp
from jax.experimental import pallas as pl
from jax.experimental.pallas import tpu as pltpu


def _set2set_kernel(x_ref, wq_ref, wr_ref, b_ref, out_ref, *,
                    processing_steps, in_channels, out_pad):
    C = in_channels
    TB = x_ref.shape[0]
    x = x_ref[...]                                    # (TB, n, C) -- hoisted out of the loop

    # Per-gate folded weights (static leading-dim slices -> (C, C) each).
    wq_i, wq_f, wq_g, wq_o = (wq_ref[k] for k in range(4))
    wr_i, wr_f, wr_g, wr_o = (wr_ref[k] for k in range(4))
    # Hoist bias broadcasts out of the step loop (JAX does not CSE broadcast_in_dim).
    b_i = jnp.broadcast_to(b_ref[0], (TB, C))
    b_f = jnp.broadcast_to(b_ref[1], (TB, C))
    b_g = jnp.broadcast_to(b_ref[2], (TB, C))
    b_o = jnp.broadcast_to(b_ref[3], (TB, C))

    def step(_, carry):
        q, r, c = carry                               # each (TB, C)
        # LSTM cell with the h == q / q_star == [q, r] fold:
        #   gate_k = act(q @ Wq_k + r @ Wr_k + b_k),  gate order [i, f, g, o].
        g_i = jax.nn.sigmoid(
            jnp.dot(q, wq_i, preferred_element_type=jnp.float32)
            + jnp.dot(r, wr_i, preferred_element_type=jnp.float32) + b_i)
        g_f = jax.nn.sigmoid(
            jnp.dot(q, wq_f, preferred_element_type=jnp.float32)
            + jnp.dot(r, wr_f, preferred_element_type=jnp.float32) + b_f)
        g_g = jnp.tanh(
            jnp.dot(q, wq_g, preferred_element_type=jnp.float32)
            + jnp.dot(r, wr_g, preferred_element_type=jnp.float32) + b_g)
        g_o = jax.nn.sigmoid(
            jnp.dot(q, wq_o, preferred_element_type=jnp.float32)
            + jnp.dot(r, wr_o, preferred_element_type=jnp.float32) + b_o)
        c_new = g_f * c + g_i * g_g
        q_new = g_o * jnp.tanh(c_new)                 # (TB, C) -- LSTM output (== next h)

        # Attention scores on the MXU: e[b, i] = <q_new[b], x[b, i]>
        e = jnp.einsum('bqd,bkd->bqk', q_new[:, None, :], x,
                       preferred_element_type=jnp.float32)[:, 0, :]       # (TB, n)
        # softmax over the set dimension
        e = e - jnp.max(e, axis=-1, keepdims=True)
        p = jnp.exp(e)
        a = p * pl.reciprocal(jnp.sum(p, axis=-1, keepdims=True), approx=True)
        # Weighted readout on the MXU: r_new[b] = sum_i a[b, i] * x[b, i]
        r_new = jnp.einsum('bqk,bkd->bqd', a[:, None, :], x,
                           preferred_element_type=jnp.float32)[:, 0, :]   # (TB, C)
        return q_new, r_new, c_new

    zeros = jnp.zeros((TB, C), jnp.float32)
    q, r, _ = jax.lax.fori_loop(0, processing_steps, step,
                                (zeros, zeros, zeros), unroll=True)

    # q_star = [q || r], padded to a lane-dense last dim, single full store.
    if out_pad > 2 * C:
        pad = jnp.zeros((TB, out_pad - 2 * C), jnp.float32)
        out_ref[...] = jnp.concatenate([q, r, pad], axis=-1)
    else:
        out_ref[...] = jnp.concatenate([q, r], axis=-1)


def _pick_batch_tile(B, n, C):
    """Batch tile: whole batch if small, else a multiple of 8 (up to 256 for the
    MXU) sized so a double-buffered x tile stays well inside VMEM even on v7x
    (64 MiB physical / 32 MiB scoped default)."""
    if B <= 8:
        return B
    budget = 12 * 1024 * 1024                         # bytes for one x tile
    row_bytes = max(n * C * 4, 1)
    tb = min(B, 256, max(8, budget // row_bytes))
    return max(8, (tb // 8) * 8)


def set2set_forward(x, w_ih, w_hh, b_ih, b_hh, processing_steps):
    """x: (B, n, C) float32.  LSTM weights in PyTorch nn.LSTM layout
    (w_ih: (4C, 2C), w_hh: (4C, C), b_*: (4C,)).  Returns q_star: (B, 2C)."""
    B, n, C = x.shape
    x = jnp.asarray(x, jnp.float32)
    w_ih = jnp.asarray(w_ih, jnp.float32)
    w_hh = jnp.asarray(w_hh, jnp.float32)
    b = jnp.asarray(b_ih, jnp.float32) + jnp.asarray(b_hh, jnp.float32)

    # Fold h == q / q_star == [q, r]:
    #   gates = q_star @ w_ih.T + h @ w_hh.T + b
    #         = q @ (w_ih[:, :C] + w_hh).T + r @ w_ih[:, C:].T + b
    # split per gate ([i, f, g, o]) into right-matmul layout (C_in, C_out).
    w_q = jnp.transpose((w_ih[:, :C] + w_hh).reshape(4, C, C), (0, 2, 1))   # (4, C, C)
    w_r = jnp.transpose(w_ih[:, C:].reshape(4, C, C), (0, 2, 1))            # (4, C, C)
    b4 = b.reshape(4, 1, C)

    TB = _pick_batch_tile(B, n, C)
    n_blocks = pl.cdiv(B, TB)
    Bp = n_blocks * TB
    if Bp != B:
        x = jnp.pad(x, ((0, Bp - B), (0, 0), (0, 0)))

    out_pad = max(2 * C, ((2 * C + 127) // 128) * 128)   # lane-dense output width

    kernel = functools.partial(_set2set_kernel,
                               processing_steps=processing_steps,
                               in_channels=C, out_pad=out_pad)

    # Raise scoped-VMEM limit only when the default would be too small.
    x_tile_bytes = TB * n * C * 4
    est = (3 * x_tile_bytes + 4 * (4 * C * C * 4)
           + 4 * TB * out_pad * 4 + (1 << 21))
    vmem_limit = None if est <= (16 << 20) else min(int(est), 48 << 20)

    out = pl.pallas_call(
        kernel,
        out_shape=jax.ShapeDtypeStruct((Bp, out_pad), jnp.float32),
        grid_spec=pltpu.PrefetchScalarGridSpec(
            num_scalar_prefetch=0,
            grid=(n_blocks,),
            in_specs=[
                pl.BlockSpec((TB, n, C), lambda i: (i, 0, 0)),   # x: streamed per batch tile
                pl.BlockSpec((4, C, C), lambda i: (0, 0, 0)),    # W_q (folded), per gate
                pl.BlockSpec((4, C, C), lambda i: (0, 0, 0)),    # W_r, per gate
                pl.BlockSpec((4, 1, C), lambda i: (0, 0, 0)),    # b_ih + b_hh, per gate
            ],
            out_specs=pl.BlockSpec((TB, out_pad), lambda i: (i, 0)),
        ),
        compiler_params=pltpu.CompilerParams(
            dimension_semantics=("parallel",),
            vmem_limit_bytes=vmem_limit),
    )(x, w_q, w_r, b4)
    return out[:B, :2 * C]


def set2set_reference(x, w_ih, w_hh, b_ih, b_hh, processing_steps):
    """Pure-JAX reference mirroring the PyTorch forward exactly."""
    B, n, C = x.shape
    h = jnp.zeros((B, C), jnp.float32)
    c = jnp.zeros((B, C), jnp.float32)
    q_star = jnp.zeros((B, 2 * C), jnp.float32)
    for _ in range(processing_steps):
        gates = q_star @ w_ih.T + h @ w_hh.T + b_ih + b_hh
        i_g = jax.nn.sigmoid(gates[:, 0 * C:1 * C])
        f_g = jax.nn.sigmoid(gates[:, 1 * C:2 * C])
        g_g = jnp.tanh(gates[:, 2 * C:3 * C])
        o_g = jax.nn.sigmoid(gates[:, 3 * C:4 * C])
        c = f_g * c + i_g * g_g
        q = o_g * jnp.tanh(c)
        h = q
        e = jnp.einsum('bj,bij->bi', q, x)
        a = jax.nn.softmax(e, axis=-1)
        r = jnp.einsum('bi,bij->bj', a, x)
        q_star = jnp.concatenate([q, r], axis=-1)
    return q_star


if __name__ == "__main__":
    B, n, C = 2, 8, 32            # batch, set size, in_channels
    processing_steps = 3

    key = jax.random.PRNGKey(0)
    kx, k1, k2, k3, k4 = jax.random.split(key, 5)
    x = jax.random.normal(kx, (B, n, C), jnp.float32)

    # nn.LSTM(input_size=2C, hidden_size=C) parameter shapes, uniform(-1/sqrt(C), 1/sqrt(C))
    k = 1.0 / jnp.sqrt(jnp.float32(C))
    w_ih = jax.random.uniform(k1, (4 * C, 2 * C), jnp.float32, -k, k)
    w_hh = jax.random.uniform(k2, (4 * C, C), jnp.float32, -k, k)
    b_ih = jax.random.uniform(k3, (4 * C,), jnp.float32, -k, k)
    b_hh = jax.random.uniform(k4, (4 * C,), jnp.float32, -k, k)

    out = set2set_forward(x, w_ih, w_hh, b_ih, b_hh, processing_steps)
    out = jax.block_until_ready(out)

    ref = set2set_reference(x, w_ih, w_hh, b_ih, b_hh, processing_steps)
    assert out.shape == (B, 2 * C)
    # Tolerance relaxed vs. 1e-5 because the softmax normalizer uses the EUP
    # approximate reciprocal (pl.reciprocal(..., approx=True)).
    assert jnp.allclose(out, ref, rtol=5e-3, atol=5e-3), (
        f"max abs err {jnp.max(jnp.abs(out - ref))}")
    print("KERNEL_OK")
</pallas_src>

<mosaic_0001>
module attributes {stable_mosaic.version = 11 : i64} {
  func.func @_set2set_kernel(%arg0: i32, %arg1: memref<2x8x32xf32, #tpu.memory_space<vmem>>, %arg2: memref<4x32x32xf32, #tpu.memory_space<vmem>>, %arg3: memref<4x32x32xf32, #tpu.memory_space<vmem>>, %arg4: memref<4x1x32xf32, #tpu.memory_space<vmem>>, %arg5: memref<2x128xf32, #tpu.memory_space<vmem>>) attributes {dimension_semantics = [#tpu.dimension_semantics<parallel>], iteration_bounds = array<i64: 1>, scalar_prefetch = 0 : i64, scratch_operands = 0 : i64, tpu.core_type = #tpu.core_type<tc>, window_params = [{transform_indices = @transform_0, window_bounds = array<i64: 2, 8, 32>}, {pipeline_mode = #tpu.pipeline_mode<synchronous>, transform_indices = @transform_1, window_bounds = array<i64: 4, 32, 32>}, {pipeline_mode = #tpu.pipeline_mode<synchronous>, transform_indices = @transform_2, window_bounds = array<i64: 4, 32, 32>}, {pipeline_mode = #tpu.pipeline_mode<synchronous>, transform_indices = @transform_3, window_bounds = array<i64: 4, 1, 32>}, {transform_indices = @transform_4, window_bounds = array<i64: 2, 128>}]} {
    %c0 = arith.constant 0 : index
    %c0_0 = arith.constant 0 : index
    %c0_1 = arith.constant 0 : index
    %0 = vector.load %arg1[%c0, %c0_0, %c0_1] : memref<2x8x32xf32, #tpu.memory_space<vmem>>, vector<2x8x32xf32>
    %c0_2 = arith.constant 0 : index
    %c0_3 = arith.constant 0 : index
    %c0_4 = arith.constant 0 : index
    %1 = vector.load %arg2[%c0_2, %c0_3, %c0_4] : memref<4x32x32xf32, #tpu.memory_space<vmem>>, vector<1x32x32xf32>
    %2 = vector.shape_cast %1 : vector<1x32x32xf32> to vector<32x32xf32>
    %c1 = arith.constant 1 : index
    %c0_5 = arith.constant 0 : index
    %c0_6 = arith.constant 0 : index
    %3 = vector.load %arg2[%c1, %c0_5, %c0_6] : memref<4x32x32xf32, #tpu.memory_space<vmem>>, vector<1x32x32xf32>
    %4 = vector.shape_cast %3 : vector<1x32x32xf32> to vector<32x32xf32>
    %c2 = arith.constant 2 : index
    %c0_7 = arith.constant 0 : index
    %c0_8 = arith.constant 0 : index
    %5 = vector.load %arg2[%c2, %c0_7, %c0_8] : memref<4x32x32xf32, #tpu.memory_space<vmem>>, vector<1x32x32xf32>
    %6 = vector.shape_cast %5 : vector<1x32x32xf32> to vector<32x32xf32>
    %c3 = arith.constant 3 : index
    %c0_9 = arith.constant 0 : index
    %c0_10 = arith.constant 0 : index
    %7 = vector.load %arg2[%c3, %c0_9, %c0_10] : memref<4x32x32xf32, #tpu.memory_space<vmem>>, vector<1x32x32xf32>
    %8 = vector.shape_cast %7 : vector<1x32x32xf32> to vector<32x32xf32>
    %c0_11 = arith.constant 0 : index
    %c0_12 = arith.constant 0 : index
    %c0_13 = arith.constant 0 : index
    %9 = vector.load %arg3[%c0_11, %c0_12, %c0_13] : memref<4x32x32xf32, #tpu.memory_space<vmem>>, vector<1x32x32xf32>
    %10 = vector.shape_cast %9 : vector<1x32x32xf32> to vector<32x32xf32>
    %c1_14 = arith.constant 1 : index
    %c0_15 = arith.constant 0 : index
    %c0_16 = arith.constant 0 : index
    %11 = vector.load %arg3[%c1_14, %c0_15, %c0_16] : memref<4x32x32xf32, #tpu.memory_space<vmem>>, vector<1x32x32xf32>
    %12 = vector.shape_cast %11 : vector<1x32x32xf32> to vector<32x32xf32>
    %c2_17 = arith.constant 2 : index
    %c0_18 = arith.constant 0 : index
    %c0_19 = arith.constant 0 : index
    %13 = vector.load %arg3[%c2_17, %c0_18, %c0_19] : memref<4x32x32xf32, #tpu.memory_space<vmem>>, vector<1x32x32xf32>
    %14 = vector.shape_cast %13 : vector<1x32x32xf32> to vector<32x32xf32>
    %c3_20 = arith.constant 3 : index
    %c0_21 = arith.constant 0 : index
    %c0_22 = arith.constant 0 : index
    %15 = vector.load %arg3[%c3_20, %c0_21, %c0_22] : memref<4x32x32xf32, #tpu.memory_space<vmem>>, vector<1x32x32xf32>
    %16 = vector.shape_cast %15 : vector<1x32x32xf32> to vector<32x32xf32>
    %c0_23 = arith.constant 0 : index
    %c0_24 = arith.constant 0 : index
    %c0_25 = arith.constant 0 : index
    %17 = vector.load %arg4[%c0_23, %c0_24, %c0_25] : memref<4x1x32xf32, #tpu.memory_space<vmem>>, vector<1x1x32xf32>
    %18 = vector.shape_cast %17 : vector<1x1x32xf32> to vector<1x32xf32>
    %19 = vector.shape_cast %18 : vector<1x32xf32> to vector<1x32xf32>
    %20 = vector.broadcast %19 : vector<1x32xf32> to vector<2x32xf32>
    %c1_26 = arith.constant 1 : index
    %c0_27 = arith.constant 0 : index
    %c0_28 = arith.constant 0 : index
    %21 = vector.load %arg4[%c1_26, %c0_27, %c0_28] : memref<4x1x32xf32, #tpu.memory_space<vmem>>, vector<1x1x32xf32>
    %22 = vector.shape_cast %21 : vector<1x1x32xf32> to vector<1x32xf32>
    %23 = vector.shape_cast %22 : vector<1x32xf32> to vector<1x32xf32>
    %24 = vector.broadcast %23 : vector<1x32xf32> to vector<2x32xf32>
    %c2_29 = arith.constant 2 : index
    %c0_30 = arith.constant 0 : index
    %c0_31 = arith.constant 0 : index
    %25 = vector.load %arg4[%c2_29, %c0_30, %c0_31] : memref<4x1x32xf32, #tpu.memory_space<vmem>>, vector<1x1x32xf32>
    %26 = vector.shape_cast %25 : vector<1x1x32xf32> to vector<1x32xf32>
    %27 = vector.shape_cast %26 : vector<1x32xf32> to vector<1x32xf32>
    %28 = vector.broadcast %27 : vector<1x32xf32> to vector<2x32xf32>
    %c3_32 = arith.constant 3 : index
    %c0_33 = arith.constant 0 : index
    %c0_34 = arith.constant 0 : index
    %29 = vector.load %arg4[%c3_32, %c0_33, %c0_34] : memref<4x1x32xf32, #tpu.memory_space<vmem>>, vector<1x1x32xf32>
    %30 = vector.shape_cast %29 : vector<1x1x32xf32> to vector<1x32xf32>
    %31 = vector.shape_cast %30 : vector<1x32xf32> to vector<1x32xf32>
    %32 = vector.broadcast %31 : vector<1x32xf32> to vector<2x32xf32>
    %cst = arith.constant 0.000000e+00 : f32
    %33 = vector.broadcast %cst : f32 to vector<2x32xf32>
    %c0_i32 = arith.constant 0 : i32
    %cst_35 = arith.constant dense<0.000000e+00> : vector<2x32xf32>
    %34 = tpu.matmul %33, %2, %cst_35 {dimension_numbers = #tpu.dot_dimension_numbers<[1], [0], [0], [1], [0, 0, 1, 1], [], []>} : vector<2x32xf32>, vector<32x32xf32>, vector<2x32xf32> -> vector<2x32xf32>
    %cst_36 = arith.constant dense<0.000000e+00> : vector<2x32xf32>
    %35 = tpu.matmul %33, %10, %cst_36 {dimension_numbers = #tpu.dot_dimension_numbers<[1], [0], [0], [1], [0, 0, 1, 1], [], []>} : vector<2x32xf32>, vector<32x32xf32>, vector<2x32xf32> -> vector<2x32xf32>
    %36 = arith.addf %34, %35 : vector<2x32xf32>
    %37 = arith.addf %36, %20 : vector<2x32xf32>
    %38 = arith.negf %37 : vector<2x32xf32>
    %39 = math.exp %38 : vector<2x32xf32>
    %cst_37 = arith.constant 1.000000e+00 : f32
    %40 = vector.broadcast %cst_37 : f32 to vector<2x32xf32>
    %41 = arith.addf %40, %39 : vector<2x32xf32>
    %42 = arith.divf %40, %41 : vector<2x32xf32>
    %cst_38 = arith.constant dense<0.000000e+00> : vector<2x32xf32>
    %43 = tpu.matmul %33, %4, %cst_38 {dimension_numbers = #tpu.dot_dimension_numbers<[1], [0], [0], [1], [0, 0, 1, 1], [], []>} : vector<2x32xf32>, vector<32x32xf32>, vector<2x32xf32> -> vector<2x32xf32>
    %cst_39 = arith.constant dense<0.000000e+00> : vector<2x32xf32>
    %44 = tpu.matmul %33, %12, %cst_39 {dimension_numbers = #tpu.dot_dimension_numbers<[1], [0], [0], [1], [0, 0, 1, 1], [], []>} : vector<2x32xf32>, vector<32x32xf32>, vector<2x32xf32> -> vector<2x32xf32>
    %45 = arith.addf %43, %44 : vector<2x32xf32>
    %46 = arith.addf %45, %24 : vector<2x32xf32>
    %47 = arith.negf %46 : vector<2x32xf32>
    %48 = math.exp %47 : vector<2x32xf32>
    %cst_40 = arith.constant 1.000000e+00 : f32
    %49 = vector.broadcast %cst_40 : f32 to vector<2x32xf32>
    %50 = arith.addf %49, %48 : vector<2x32xf32>
    %51 = arith.divf %49, %50 : vector<2x32xf32>
    %cst_41 = arith.constant dense<0.000000e+00> : vector<2x32xf32>
    %52 = tpu.matmul %33, %6, %cst_41 {dimension_numbers = #tpu.dot_dimension_numbers<[1], [0], [0], [1], [0, 0, 1, 1], [], []>} : vector<2x32xf32>, vector<32x32xf32>, vector<2x32xf32> -> vector<2x32xf32>
    %cst_42 = arith.constant dense<0.000000e+00> : vector<2x32xf32>
    %53 = tpu.matmul %33, %14, %cst_42 {dimension_numbers = #tpu.dot_dimension_numbers<[1], [0], [0], [1], [0, 0, 1, 1], [], []>} : vector<2x32xf32>, vector<32x32xf32>, vector<2x32xf32> -> vector<2x32xf32>
    %54 = arith.addf %52, %53 : vector<2x32xf32>
    %55 = arith.addf %54, %28 : vector<2x32xf32>
    %56 = math.tanh %55 : vector<2x32xf32>
    %cst_43 = arith.constant dense<0.000000e+00> : vector<2x32xf32>
    %57 = tpu.matmul %33, %8, %cst_43 {dimension_numbers = #tpu.dot_dimension_numbers<[1], [0], [0], [1], [0, 0, 1, 1], [], []>} : vector<2x32xf32>, vector<32x32xf32>, vector<2x32xf32> -> vector<2x32xf32>
    %cst_44 = arith.constant dense<0.000000e+00> : vector<2x32xf32>
    %58 = tpu.matmul %33, %16, %cst_44 {dimension_numbers = #tpu.dot_dimension_numbers<[1], [0], [0], [1], [0, 0, 1, 1], [], []>} : vector<2x32xf32>, vector<32x32xf32>, vector<2x32xf32> -> vector<2x32xf32>
    %59 = arith.addf %57, %58 : vector<2x32xf32>
    %60 = arith.addf %59, %32 : vector<2x32xf32>
    %61 = arith.negf %60 : vector<2x32xf32>
    %62 = math.exp %61 : vector<2x32xf32>
    %cst_45 = arith.constant 1.000000e+00 : f32
    %63 = vector.broadcast %cst_45 : f32 to vector<2x32xf32>
    %64 = arith.addf %63, %62 : vector<2x32xf32>
    %65 = arith.divf %63, %64 : vector<2x32xf32>
    %66 = arith.mulf %51, %33 : vector<2x32xf32>
    %67 = arith.mulf %42, %56 : vector<2x32xf32>
    %68 = arith.addf %66, %67 : vector<2x32xf32>
    %69 = math.tanh %68 : vector<2x32xf32>
    %70 = arith.mulf %65, %69 : vector<2x32xf32>
    %71 = vector.shape_cast %70 : vector<2x32xf32> to vector<2x1x32xf32>
    "tpu.trace_start"() <{level = 10 : i32, message = "bqd,bkd->bqk"}> : () -> ()
    %cst_46 = arith.constant dense<0.000000e+00> : vector<2x1x8xf32>
    %72 = tpu.matmul %71, %0, %cst_46 {dimension_numbers = #tpu.dot_dimension_numbers<[2], [2], [1], [1], [0, 0, 0, 1, 1, 1], [0], [0]>} : vector<2x1x32xf32>, vector<2x8x32xf32>, vector<2x1x8xf32> -> vector<2x1x8xf32>
    "tpu.trace_stop"() : () -> ()
    %73 = vector.shape_cast %72 : vector<2x1x8xf32> to vector<2x8xf32>
    %cst_47 = arith.constant dense<0xFF800000> : vector<2xf32>
    %74 = vector.multi_reduction <maximumf>, %73, %cst_47 [1] : vector<2x8xf32> to vector<2xf32>
    %75 = vector.shape_cast %74 : vector<2xf32> to vector<2x1xf32>
    %76 = vector.broadcast %75 : vector<2x1xf32> to vector<2x8xf32>
    %77 = arith.subf %73, %76 : vector<2x8xf32>
    %78 = math.exp %77 : vector<2x8xf32>
    %cst_48 = arith.constant dense<0.000000e+00> : vector<2xf32>
    %79 = vector.multi_reduction <add>, %78, %cst_48 [1] : vector<2x8xf32> to vector<2xf32>
    %80 = vector.shape_cast %79 : vector<2xf32> to vector<2x1xf32>
    %81 = tpu.reciprocal %80 {approx = true} : vector<2x1xf32> -> vector<2x1xf32>
    %82 = vector.broadcast %81 : vector<2x1xf32> to vector<2x8xf32>
    %83 = arith.mulf %78, %82 : vector<2x8xf32>
    %84 = vector.shape_cast %83 : vector<2x8xf32> to vector<2x1x8xf32>
    "tpu.trace_start"() <{level = 10 : i32, message = "bqk,bkd->bqd"}> : () -> ()
    %cst_49 = arith.constant dense<0.000000e+00> : vector<2x1x32xf32>
    %85 = tpu.matmul %84, %0, %cst_49 {dimension_numbers = #tpu.dot_dimension_numbers<[2], [1], [1], [2], [0, 0, 0, 1, 1, 2], [0], [0]>} : vector<2x1x8xf32>, vector<2x8x32xf32>, vector<2x1x32xf32> -> vector<2x1x32xf32>
    "tpu.trace_stop"() : () -> ()
    %86 = vector.shape_cast %85 : vector<2x1x32xf32> to vector<2x32xf32>
    %c1_i32 = arith.constant 1 : i32
    %cst_50 = arith.constant dense<0.000000e+00> : vector<2x32xf32>
    %87 = tpu.matmul %70, %2, %cst_50 {dimension_numbers = #tpu.dot_dimension_numbers<[1], [0], [0], [1], [0, 0, 1, 1], [], []>} : vector<2x32xf32>, vector<32x32xf32>, vector<2x32xf32> -> vector<2x32xf32>
    %cst_51 = arith.constant dense<0.000000e+00> : vector<2x32xf32>
    %88 = tpu.matmul %86, %10, %cst_51 {dimension_numbers = #tpu.dot_dimension_numbers<[1], [0], [0], [1], [0, 0, 1, 1], [], []>} : vector<2x32xf32>, vector<32x32xf32>, vector<2x32xf32> -> vector<2x32xf32>
    %89 = arith.addf %87, %88 : vector<2x32xf32>
    %90 = arith.addf %89, %20 : vector<2x32xf32>
    %91 = arith.negf %90 : vector<2x32xf32>
    %92 = math.exp %91 : vector<2x32xf32>
    %cst_52 = arith.constant 1.000000e+00 : f32
    %93 = vector.broadcast %cst_52 : f32 to vector<2x32xf32>
    %94 = arith.addf %93, %92 : vector<2x32xf32>
    %95 = arith.divf %93, %94 : vector<2x32xf32>
    %cst_53 = arith.constant dense<0.000000e+00> : vector<2x32xf32>
    %96 = tpu.matmul %70, %4, %cst_53 {dimension_numbers = #tpu.dot_dimension_numbers<[1], [0], [0], [1], [0, 0, 1, 1], [], []>} : vector<2x32xf32>, vector<32x32xf32>, vector<2x32xf32> -> vector<2x32xf32>
    %cst_54 = arith.constant dense<0.000000e+00> : vector<2x32xf32>
    %97 = tpu.matmul %86, %12, %cst_54 {dimension_numbers = #tpu.dot_dimension_numbers<[1], [0], [0], [1], [0, 0, 1, 1], [], []>} : vector<2x32xf32>, vector<32x32xf32>, vector<2x32xf32> -> vector<2x32xf32>
    %98 = arith.addf %96, %97 : vector<2x32xf32>
    %99 = arith.addf %98, %24 : vector<2x32xf32>
    %100 = arith.negf %99 : vector<2x32xf32>
    %101 = math.exp %100 : vector<2x32xf32>
    %cst_55 = arith.constant 1.000000e+00 : f32
    %102 = vector.broadcast %cst_55 : f32 to vector<2x32xf32>
    %103 = arith.addf %102, %101 : vector<2x32xf32>
    %104 = arith.divf %102, %103 : vector<2x32xf32>
    %cst_56 = arith.constant dense<0.000000e+00> : vector<2x32xf32>
    %105 = tpu.matmul %70, %6, %cst_56 {dimension_numbers = #tpu.dot_dimension_numbers<[1], [0], [0], [1], [0, 0, 1, 1], [], []>} : vector<2x32xf32>, vector<32x32xf32>, vector<2x32xf32> -> vector<2x32xf32>
    %cst_57 = arith.constant dense<0.000000e+00> : vector<2x32xf32>
    %106 = tpu.matmul %86, %14, %cst_57 {dimension_numbers = #tpu.dot_dimension_numbers<[1], [0], [0], [1], [0, 0, 1, 1], [], []>} : vector<2x32xf32>, vector<32x32xf32>, vector<2x32xf32> -> vector<2x32xf32>
    %107 = arith.addf %105, %106 : vector<2x32xf32>
    %108 = arith.addf %107, %28 : vector<2x32xf32>
    %109 = math.tanh %108 : vector<2x32xf32>
    %cst_58 = arith.constant dense<0.000000e+00> : vector<2x32xf32>
    %110 = tpu.matmul %70, %8, %cst_58 {dimension_numbers = #tpu.dot_dimension_numbers<[1], [0], [0], [1], [0, 0, 1, 1], [], []>} : vector<2x32xf32>, vector<32x32xf32>, vector<2x32xf32> -> vector<2x32xf32>
    %cst_59 = arith.constant dense<0.000000e+00> : vector<2x32xf32>
    %111 = tpu.matmul %86, %16, %cst_59 {dimension_numbers = #tpu.dot_dimension_numbers<[1], [0], [0], [1], [0, 0, 1, 1], [], []>} : vector<2x32xf32>, vector<32x32xf32>, vector<2x32xf32> -> vector<2x32xf32>
    %112 = arith.addf %110, %111 : vector<2x32xf32>
    %113 = arith.addf %112, %32 : vector<2x32xf32>
    %114 = arith.negf %113 : vector<2x32xf32>
    %115 = math.exp %114 : vector<2x32xf32>
    %cst_60 = arith.constant 1.000000e+00 : f32
    %116 = vector.broadcast %cst_60 : f32 to vector<2x32xf32>
    %117 = arith.addf %116, %115 : vector<2x32xf32>
    %118 = arith.divf %116, %117 : vector<2x32xf32>
    %119 = arith.mulf %104, %68 : vector<2x32xf32>
    %120 = arith.mulf %95, %109 : vector<2x32xf32>
    %121 = arith.addf %119, %120 : vector<2x32xf32>
    %122 = math.tanh %121 : vector<2x32xf32>
    %123 = arith.mulf %118, %122 : vector<2x32xf32>
    %124 = vector.shape_cast %123 : vector<2x32xf32> to vector<2x1x32xf32>
    "tpu.trace_start"() <{level = 10 : i32, message = "bqd,bkd->bqk"}> : () -> ()
    %cst_61 = arith.constant dense<0.000000e+00> : vector<2x1x8xf32>
    %125 = tpu.matmul %124, %0, %cst_61 {dimension_numbers = #tpu.dot_dimension_numbers<[2], [2], [1], [1], [0, 0, 0, 1, 1, 1], [0], [0]>} : vector<2x1x32xf32>, vector<2x8x32xf32>, vector<2x1x8xf32> -> vector<2x1x8xf32>
    "tpu.trace_stop"() : () -> ()
    %126 = vector.shape_cast %125 : vector<2x1x8xf32> to vector<2x8xf32>
    %cst_62 = arith.constant dense<0xFF800000> : vector<2xf32>
    %127 = vector.multi_reduction <maximumf>, %126, %cst_62 [1] : vector<2x8xf32> to vector<2xf32>
    %128 = vector.shape_cast %127 : vector<2xf32> to vector<2x1xf32>
    %129 = vector.broadcast %128 : vector<2x1xf32> to vector<2x8xf32>
    %130 = arith.subf %126, %129 : vector<2x8xf32>
    %131 = math.exp %130 : vector<2x8xf32>
    %cst_63 = arith.constant dense<0.000000e+00> : vector<2xf32>
    %132 = vector.multi_reduction <add>, %131, %cst_63 [1] : vector<2x8xf32> to vector<2xf32>
    %133 = vector.shape_cast %132 : vector<2xf32> to vector<2x1xf32>
    %134 = tpu.reciprocal %133 {approx = true} : vector<2x1xf32> -> vector<2x1xf32>
    %135 = vector.broadcast %134 : vector<2x1xf32> to vector<2x8xf32>
    %136 = arith.mulf %131, %135 : vector<2x8xf32>
    %137 = vector.shape_cast %136 : vector<2x8xf32> to vector<2x1x8xf32>
    "tpu.trace_start"() <{level = 10 : i32, message = "bqk,bkd->bqd"}> : () -> ()
    %cst_64 = arith.constant dense<0.000000e+00> : vector<2x1x32xf32>
    %138 = tpu.matmul %137, %0, %cst_64 {dimension_numbers = #tpu.dot_dimension_numbers<[2], [1], [1], [2], [0, 0, 0, 1, 1, 2], [0], [0]>} : vector<2x1x8xf32>, vector<2x8x32xf32>, vector<2x1x32xf32> -> vector<2x1x32xf32>
    "tpu.trace_stop"() : () -> ()
    %139 = vector.shape_cast %138 : vector<2x1x32xf32> to vector<2x32xf32>
    %c2_i32 = arith.constant 2 : i32
    %cst_65 = arith.constant dense<0.000000e+00> : vector<2x32xf32>
    %140 = tpu.matmul %123, %2, %cst_65 {dimension_numbers = #tpu.dot_dimension_numbers<[1], [0], [0], [1], [0, 0, 1, 1], [], []>} : vector<2x32xf32>, vector<32x32xf32>, vector<2x32xf32> -> vector<2x32xf32>
    %cst_66 = arith.constant dense<0.000000e+00> : vector<2x32xf32>
    %141 = tpu.matmul %139, %10, %cst_66 {dimension_numbers = #tpu.dot_dimension_numbers<[1], [0], [0], [1], [0, 0, 1, 1], [], []>} : vector<2x32xf32>, vector<32x32xf32>, vector<2x32xf32> -> vector<2x32xf32>
    %142 = arith.addf %140, %141 : vector<2x32xf32>
    %143 = arith.addf %142, %20 : vector<2x32xf32>
    %144 = arith.negf %143 : vector<2x32xf32>
    %145 = math.exp %144 : vector<2x32xf32>
    %cst_67 = arith.constant 1.000000e+00 : f32
    %146 = vector.broadcast %cst_67 : f32 to vector<2x32xf32>
    %147 = arith.addf %146, %145 : vector<2x32xf32>
    %148 = arith.divf %146, %147 : vector<2x32xf32>
    %cst_68 = arith.constant dense<0.000000e+00> : vector<2x32xf32>
    %149 = tpu.matmul %123, %4, %cst_68 {dimension_numbers = #tpu.dot_dimension_numbers<[1], [0], [0], [1], [0, 0, 1, 1], [], []>} : vector<2x32xf32>, vector<32x32xf32>, vector<2x32xf32> -> vector<2x32xf32>
    %cst_69 = arith.constant dense<0.000000e+00> : vector<2x32xf32>
    %150 = tpu.matmul %139, %12, %cst_69 {dimension_numbers = #tpu.dot_dimension_numbers<[1], [0], [0], [1], [0, 0, 1, 1], [], []>} : vector<2x32xf32>, vector<32x32xf32>, vector<2x32xf32> -> vector<2x32xf32>
    %151 = arith.addf %149, %150 : vector<2x32xf32>
    %152 = arith.addf %151, %24 : vector<2x32xf32>
    %153 = arith.negf %152 : vector<2x32xf32>
    %154 = math.exp %153 : vector<2x32xf32>
    %cst_70 = arith.constant 1.000000e+00 : f32
    %155 = vector.broadcast %cst_70 : f32 to vector<2x32xf32>
    %156 = arith.addf %155, %154 : vector<2x32xf32>
    %157 = arith.divf %155, %156 : vector<2x32xf32>
    %cst_71 = arith.constant dense<0.000000e+00> : vector<2x32xf32>
    %158 = tpu.matmul %123, %6, %cst_71 {dimension_numbers = #tpu.dot_dimension_numbers<[1], [0], [0], [1], [0, 0, 1, 1], [], []>} : vector<2x32xf32>, vector<32x32xf32>, vector<2x32xf32> -> vector<2x32xf32>
    %cst_72 = arith.constant dense<0.000000e+00> : vector<2x32xf32>
    %159 = tpu.matmul %139, %14, %cst_72 {dimension_numbers = #tpu.dot_dimension_numbers<[1], [0], [0], [1], [0, 0, 1, 1], [], []>} : vector<2x32xf32>, vector<32x32xf32>, vector<2x32xf32> -> vector<2x32xf32>
    %160 = arith.addf %158, %159 : vector<2x32xf32>
    %161 = arith.addf %160, %28 : vector<2x32xf32>
    %162 = math.tanh %161 : vector<2x32xf32>
    %cst_73 = arith.constant dense<0.000000e+00> : vector<2x32xf32>
    %163 = tpu.matmul %123, %8, %cst_73 {dimension_numbers = #tpu.dot_dimension_numbers<[1], [0], [0], [1], [0, 0, 1, 1], [], []>} : vector<2x32xf32>, vector<32x32xf32>, vector<2x32xf32> -> vector<2x32xf32>
    %cst_74 = arith.constant dense<0.000000e+00> : vector<2x32xf32>
    %164 = tpu.matmul %139, %16, %cst_74 {dimension_numbers = #tpu.dot_dimension_numbers<[1], [0], [0], [1], [0, 0, 1, 1], [], []>} : vector<2x32xf32>, vector<32x32xf32>, vector<2x32xf32> -> vector<2x32xf32>
    %165 = arith.addf %163, %164 : vector<2x32xf32>
    %166 = arith.addf %165, %32 : vector<2x32xf32>
    %167 = arith.negf %166 : vector<2x32xf32>
    %168 = math.exp %167 : vector<2x32xf32>
    %cst_75 = arith.constant 1.000000e+00 : f32
    %169 = vector.broadcast %cst_75 : f32 to vector<2x32xf32>
    %170 = arith.addf %169, %168 : vector<2x32xf32>
    %171 = arith.divf %169, %170 : vector<2x32xf32>
    %172 = arith.mulf %157, %121 : vector<2x32xf32>
    %173 = arith.mulf %148, %162 : vector<2x32xf32>
    %174 = arith.addf %172, %173 : vector<2x32xf32>
    %175 = math.tanh %174 : vector<2x32xf32>
    %176 = arith.mulf %171, %175 : vector<2x32xf32>
    %177 = vector.shape_cast %176 : vector<2x32xf32> to vector<2x1x32xf32>
    "tpu.trace_start"() <{level = 10 : i32, message = "bqd,bkd->bqk"}> : () -> ()
    %cst_76 = arith.constant dense<0.000000e+00> : vector<2x1x8xf32>
    %178 = tpu.matmul %177, %0, %cst_76 {dimension_numbers = #tpu.dot_dimension_numbers<[2], [2], [1], [1], [0, 0, 0, 1, 1, 1], [0], [0]>} : vector<2x1x32xf32>, vector<2x8x32xf32>, vector<2x1x8xf32> -> vector<2x1x8xf32>
    "tpu.trace_stop"() : () -> ()
    %179 = vector.shape_cast %178 : vector<2x1x8xf32> to vector<2x8xf32>
    %cst_77 = arith.constant dense<0xFF800000> : vector<2xf32>
    %180 = vector.multi_reduction <maximumf>, %179, %cst_77 [1] : vector<2x8xf32> to vector<2xf32>
    %181 = vector.shape_cast %180 : vector<2xf32> to vector<2x1xf32>
    %182 = vector.broadcast %181 : vector<2x1xf32> to vector<2x8xf32>
    %183 = arith.subf %179, %182 : vector<2x8xf32>
    %184 = math.exp %183 : vector<2x8xf32>
    %cst_78 = arith.constant dense<0.000000e+00> : vector<2xf32>
    %185 = vector.multi_reduction <add>, %184, %cst_78 [1] : vector<2x8xf32> to vector<2xf32>
    %186 = vector.shape_cast %185 : vector<2xf32> to vector<2x1xf32>
    %187 = tpu.reciprocal %186 {approx = true} : vector<2x1xf32> -> vector<2x1xf32>
    %188 = vector.broadcast %187 : vector<2x1xf32> to vector<2x8xf32>
    %189 = arith.mulf %184, %188 : vector<2x8xf32>
    %190 = vector.shape_cast %189 : vector<2x8xf32> to vector<2x1x8xf32>
    "tpu.trace_start"() <{level = 10 : i32, message = "bqk,bkd->bqd"}> : () -> ()
    %cst_79 = arith.constant dense<0.000000e+00> : vector<2x1x32xf32>
    %191 = tpu.matmul %190, %0, %cst_79 {dimension_numbers = #tpu.dot_dimension_numbers<[2], [1], [1], [2], [0, 0, 0, 1, 1, 2], [0], [0]>} : vector<2x1x8xf32>, vector<2x8x32xf32>, vector<2x1x32xf32> -> vector<2x1x32xf32>
    "tpu.trace_stop"() : () -> ()
    %192 = vector.shape_cast %191 : vector<2x1x32xf32> to vector<2x32xf32>
    %cst_80 = arith.constant 0.000000e+00 : f32
    %193 = vector.broadcast %cst_80 : f32 to vector<2x64xf32>
    %194 = tpu.concatenate %176, %192, %193 in 1 : vector<2x32xf32>, vector<2x32xf32>, vector<2x64xf32> -> vector<2x128xf32>
    %c0_81 = arith.constant 0 : index
    %c0_82 = arith.constant 0 : index
    %195 = vector.load %arg5[%c0_81, %c0_82] : memref<2x128xf32, #tpu.memory_space<vmem>>, vector<2x128xf32>
    tpu.vector_store %arg5[%c0_81, %c0_82], %194 {strides = array<i32>} : memref<2x128xf32, #tpu.memory_space<vmem>>, vector<2x128xf32>,
    return
  }
  func.func @transform_0(%arg0: i32) -> (i32, i32, i32) {
    %c0_i32 = arith.constant 0 : i32
    %c0_i32_0 = arith.constant 0 : i32
    %c0_i32_1 = arith.constant 0 : i32
    return %arg0, %c0_i32, %c0_i32_0 : i32, i32, i32
  }
  func.func @transform_1(%arg0: i32) -> (i32, i32, i32) {
    %c0_i32 = arith.constant 0 : i32
    %c0_i32_0 = arith.constant 0 : i32
    %c0_i32_1 = arith.constant 0 : i32
    %c0_i32_2 = arith.constant 0 : i32
    return %c0_i32, %c0_i32_0, %c0_i32_1 : i32, i32, i32
  }
  func.func @transform_2(%arg0: i32) -> (i32, i32, i32) {
    %c0_i32 = arith.constant 0 : i32
    %c0_i32_0 = arith.constant 0 : i32
    %c0_i32_1 = arith.constant 0 : i32
    %c0_i32_2 = arith.constant 0 : i32
    return %c0_i32, %c0_i32_0, %c0_i32_1 : i32, i32, i32
  }
  func.func @transform_3(%arg0: i32) -> (i32, i32, i32) {
    %c0_i32 = arith.constant 0 : i32
    %c0_i32_0 = arith.constant 0 : i32
    %c0_i32_1 = arith.constant 0 : i32
    %c0_i32_2 = arith.constant 0 : i32
    return %c0_i32, %c0_i32_0, %c0_i32_1 : i32, i32, i32
  }
  func.func @transform_4(%arg0: i32) -> (i32, i32) {
    %c0_i32 = arith.constant 0 : i32
    %c0_i32_0 = arith.constant 0 : i32
    return %arg0, %c0_i32 : i32, i32
  }
}

</mosaic_0001>

<bundles_post_ra>
// kernel: tpu_custom_call.1
= control target key start
LH: loop header
LB: loop body
LE: loop exit
PB: predicated region body
PF: predicated region fallthrough
CT: control target
= control target key end

     0   :  { %9 = vsyncpa [#allocation3], 0  ;;  %s4272_s0 = inlined_call_operand.hbm [shape: f32[2,8,32], index: 0, kind: input, shape index: {}]   ;;  %s4273_s1 = inlined_call_operand.hbm [shape: f32[4,32,32], index: 1, kind: input, shape index: {}]   ;;  %s4274_s2 = inlined_call_operand.hbm [shape: f32[4,32,32], index: 2, kind: input, shape index: {}]   ;;  %s4275_s3 = inlined_call_operand.vmem [shape: f32[4,1,32], index: 3, kind: input, shape index: {}]   ;;  %s4276_s4 = inlined_call_operand.hbm [shape: f32[2,128], index: 4, kind: output, shape index: {}]  }
   0x1   :  { %10 = vsyncpa [#allocation6], 0 }
   0x2   :  { %11 = vsyncpa [#allocation4], 0  ;;  %s3821_s15 = smov [#allocation5]   ;;  %s3822_s17 = smov [#allocation2]  }
   0x3   :  { %s29_s16 = sshll.u32 %s3821_s15, 4  ;;  %s17_s18 = sshll.u32 %s3822_s17, 4  ;;  %s30_s16 = int_to_ptr.vmem [resolvable:$true] %s29_s16  ;;  %s3857_s18 = int_to_ptr.vmem [resolvable:$true] %s17_s18 }
   0x4   :  { %s3727_s21 = scalar_lea.hbm %s4273_s1, 2048 }
   0x5   :  { %p3728_p0 = scmp.ne.s32.totalorder %s4273_s1, %s3727_s21  ;;  %p3731_p1 = scmp.lt.u32.totalorder %s3727_s21, %s4273_s1 }
   0x7   :  { %p3733_p2 = pnand %p3731_p1, %p3728_p0 }
   0x9   :  { %3736 = shalt.err (!%p3733_p2)
}
   0xa   :  { %s3737_s26 = scalar_lea.vmem %s30_s16, 2048  ;;  %p3742_p4 = scmp.lt.s32.totalorder %s30_s16, %s30_s16 }
   0xb   :  { %p3738_p3 = scmp.ne.s32.totalorder %s30_s16, %s3737_s26  ;;  %p3743_p5 = scmp.lt.s32.totalorder %s3737_s26, %s3737_s26 }
   0xd   :  { %p3744_p6 = por %p3743_p5, %p3742_p4 }
   0xf   :  { %p3745_p7 = pnand %p3744_p6, %p3738_p3 }
  0x11   :  { %3748 = shalt.err (!%p3745_p7)
}
  0x12   :  { %s3823_s27 = smov 128   ;;  %s3824_s28 = smov 8  }
  0x13   :  { %35 = dma.hbm_to_vmem [thread:$0]  %s4273_s1, 2048, %s30_s16, [#allocation6], %s3823_s27, %s3823_s27, %s3824_s28  }
  0x14   :  { %s3749_s7 = scalar_lea.hbm %s4272_s0, 256 }
  0x15   :  { %p3750_p8 = scmp.ne.s32.totalorder %s4272_s0, %s3749_s7  ;;  %p3753_p9 = scmp.lt.u32.totalorder %s3749_s7, %s4272_s0 }
  0x17   :  { %p3755_p10 = pnand %p3753_p9, %p3750_p8 }
  0x19   :  { %3758 = shalt.err (!%p3755_p10)
}
  0x1a   :  { %s3759_s12 = scalar_lea.vmem %s3857_s18, 256  ;;  %p3764_p12 = scmp.lt.s32.totalorder %s3857_s18, %s3857_s18 }
  0x1b   :  { %p3760_p11 = scmp.ne.s32.totalorder %s3857_s18, %s3759_s12  ;;  %p3765_p13 = scmp.lt.s32.totalorder %s3759_s12, %s3759_s12 }
  0x1d   :  { %p3766_p0 = por %p3765_p13, %p3764_p12 }
  0x1f   :  { %p3767_p1 = pnand %p3766_p0, %p3760_p11 }
  0x21   :  { %3770 = shalt.err (!%p3767_p1)
}
  0x22   :  { %23 = dma.hbm_to_vmem [thread:$0]  %s4272_s0, 256, %s3857_s18, [#allocation3], %s3823_s27, %s3823_s27, %s3824_s28  }
  0x23   :  { %s3825_s14 = smov [#allocation7]   ;;  %s3771_s19 = scalar_lea.hbm %s4274_s2, 2048 }
  0x24   :  { %s41_s15 = sshll.u32 %s3825_s14, 4  ;;  %p3772_p2 = scmp.ne.s32.totalorder %s4274_s2, %s3771_s19  ;;  %s42_s15 = int_to_ptr.vmem [resolvable:$true] %s41_s15 }
  0x25   :  { %p3775_p3 = scmp.lt.u32.totalorder %s3771_s19, %s4274_s2 }
  0x27   :  { %p3777_p4 = pnand %p3775_p3, %p3772_p2 }
  0x29   :  { %3780 = shalt.err (!%p3777_p4)
}
  0x2a   :  { %s3781_s24 = scalar_lea.vmem %s42_s15, 2048  ;;  %p3786_p6 = scmp.lt.s32.totalorder %s42_s15, %s42_s15 }
  0x2b   :  { %p3782_p5 = scmp.ne.s32.totalorder %s42_s15, %s3781_s24  ;;  %p3787_p7 = scmp.lt.s32.totalorder %s3781_s24, %s3781_s24 }
  0x2d   :  { %p3788_p8 = por %p3787_p7, %p3786_p6 }
  0x2f   :  { %p3789_p9 = pnand %p3788_p8, %p3782_p5 }
  0x31   :  { %3792 = shalt.err (!%p3789_p9)
}
  0x32   :  { %47 = dma.hbm_to_vmem [thread:$0]  %s4274_s2, 2048, %s42_s15, [#allocation6], %s3823_s27, %s3823_s27, %s3824_s28  }
  0x33   :  { %3815 = dma.done.wait [#allocation3], 256  }
  0x34   :  { %3816 = vsyncadd [#allocation3], 4294967040 }
  0x35   :  { %3817 = dma.done.wait [#allocation6], 4096  }
  0x36   :  { %3818 = vsyncadd [#allocation6], 4294963200  ;;  %v3826_v0 = vmov 0.0|0.0   ;;  %vm3827_vm0 = vmmov 0   ;;  %v3828_v1 = vmov 0.0   ;;  %v80_v2 = vld [vmem:[#allocation7] sm:$0xff] }
  0x37   :  { %3506 = vmatprep.subr.bf16.mxu0 %v3826_v0  ;;  %3512 = vmatprep.subr.bf16.mxu1 %v3826_v0  ;;  %v81_v3 = vld [vmem:[#allocation7 + $0x8] sm:$0xff]  ;;  %v61_v4 = vld [vmem:[#allocation5] sm:$0xff]  ;;  %v82_v7 = vld [vmem:[#allocation7 + $0x10] sm:$0xff]  ;;  %vm130_vm1 = vcmask 261120   ;;  %vm898_vm2 = vcmask 1041409   ;;  %vm901_vm3 = vcmask 58368  }
  0x38   :  { %3190 = vmatprep.mubr.msk.f32.mxu0 %vm3827_vm0, %v3828_v1  ;;  %3201 = vmatprep.mubr.msk.f32.mxu1 %vm3827_vm0, %v3828_v1  ;;  %v3915_v5 = vpack.c.bf16 %v81_v3, %v80_v2  ;;  %v62_v6 = vld [vmem:[#allocation5 + $0x8] sm:$0xff]  ;;  %v83_v8 = vld [vmem:[#allocation7 + $0x18] sm:$0xff]  ;;  %v63_v10 = vld [vmem:[#allocation5 + $0x10] sm:$0xff]  ;;  %vm930_vm4 = vcmask 64512   ;;  %s3831_s6 = smov [#allocation8]   ;;  %vm2969_vm5 = vcmask 523264  }
  0x39   :  { %v3917_v9 = vpack.c.bf16 %v62_v6, %v61_v4  ;;  %v64_v11 = vld [vmem:[#allocation5 + $0x18] sm:$0xff]  ;;  %v3920_v12 = vpack.c.bf16 %v83_v8, %v82_v7  ;;  %v85_v14 = vld [vmem:[#allocation7 + $0x20] sm:$0xff]  ;;  %v86_v15 = vld [vmem:[#allocation7 + $0x28] sm:$0xff]  ;;  %s2978_s7 = sshll.u32 %s3831_s6, 4  ;;  %s2979_s7 = int_to_ptr.vmem [resolvable:$true] %s2978_s7 }
  0x3a   :  { %3508 = vmatpush3.bf16.msra.mxu0 %v3915_v5  ;;  %v3924_v13 = vpack.c.bf16 %v64_v11, %v63_v10  ;;  %v66_v16 = vld [vmem:[#allocation5 + $0x20] sm:$0xff]  ;;  %v67_v17 = vld [vmem:[#allocation5 + $0x28] sm:$0xff]  ;;  %v3928_v18 = vpack.c.bf16 %v86_v15, %v85_v14  ;;  %v87_v20 = vld [vmem:[#allocation7 + $0x30] sm:$0xff]  ;;  %s3793_s8 = scalar_lea.vmem %s2979_s7, 32  ;;  %p3798_p11 = scmp.lt.s32.totalorder %s2979_s7, %s2979_s7 }
  0x3b   :  { %3514 = vmatpush3.bf16.msra.mxu1 %v3917_v9  ;;  %3509 = vmatprep.subr.bf16.mxu0 %v3826_v0  ;;  %v3932_v19 = vpack.c.bf16 %v67_v17, %v66_v16  ;;  %v88_v21 = vld [vmem:[#allocation7 + $0x38] sm:$0xff]  ;;  %v68_v22 = vld [vmem:[#allocation5 + $0x30] sm:$0xff]  ;;  %v90_v26 = vld [vmem:[#allocation7 + $0x40] sm:$0xff]  ;;  %p3794_p10 = scmp.ne.s32.totalorder %s2979_s7, %s3793_s8  ;;  %p3799_p12 = scmp.lt.s32.totalorder %s3793_s8, %s3793_s8 }
  0x3c   :  { %3515 = vmatprep.subr.bf16.mxu1 %v3826_v0  ;;  %v69_v23 = vld [vmem:[#allocation5 + $0x38] sm:$0xff]  ;;  %v3938_v24 = vpack.c.bf16 %v88_v21, %v87_v20  ;;  %v91_v27 = vld [vmem:[#allocation7 + $0x48] sm:$0xff]  ;;  %v71_v28 = vld [vmem:[#allocation5 + $0x40] sm:$0xff] }
  0x3d   :  { %v3942_v25 = vpack.c.bf16 %v69_v23, %v68_v22  ;;  %v72_v29 = vld [vmem:[#allocation5 + $0x48] sm:$0xff]  ;;  %v3950_v30 = vpack.c.bf16 %v91_v27, %v90_v26  ;;  %v92_v32 = vld [vmem:[#allocation7 + $0x50] sm:$0xff]  ;;  %v93_v33 = vld [vmem:[#allocation7 + $0x58] sm:$0xff]  ;;  %p3800_p13 = por %p3799_p12, %p3798_p11 }
  0x3e   :  { %3511 = vmatpush3.bf16.msra.mxu0 %v3920_v12  ;;  %v3954_v31 = vpack.c.bf16 %v72_v29, %v71_v28  ;;  %v73_v34 = vld [vmem:[#allocation5 + $0x50] sm:$0xff]  ;;  %v74_v35 = vld [vmem:[#allocation5 + $0x58] sm:$0xff]  ;;  %v3960_v36 = vpack.c.bf16 %v93_v33, %v92_v32  ;;  %v95_v38 = vld [vmem:[#allocation7 + $0x60] sm:$0xff] }
  0x3f   :  { %3517 = vmatpush3.bf16.msra.mxu1 %v3924_v13  ;;  %3518 = vmatprep.subr.bf16.mxu0 %v3826_v0  ;;  %v3964_v37 = vpack.c.bf16 %v74_v35, %v73_v34  ;;  %v96_v39 = vld [vmem:[#allocation7 + $0x68] sm:$0xff]  ;;  %v76_v40 = vld [vmem:[#allocation5 + $0x60] sm:$0xff]  ;;  %v97_v44 = vld [vmem:[#allocation7 + $0x70] sm:$0xff]  ;;  %p3801_p0 = pnand %p3800_p13, %p3794_p10 }
  0x40   :  { %3524 = vmatprep.subr.bf16.mxu1 %v3826_v0  ;;  %v77_v41 = vld [vmem:[#allocation5 + $0x68] sm:$0xff]  ;;  %v3972_v42 = vpack.c.bf16 %v96_v39, %v95_v38  ;;  %v98_v45 = vld [vmem:[#allocation7 + $0x78] sm:$0xff]  ;;  %v78_v46 = vld [vmem:[#allocation5 + $0x70] sm:$0xff] }
  0x41   :  { %3191 = vmatmul.mubr.f32.vlgmr.msra.gmra.mrb[0].mxu0 %v3828_v1  ;;  %v3976_v43 = vpack.c.bf16 %v77_v41, %v76_v40  ;;  %v79_v47 = vld [vmem:[#allocation5 + $0x78] sm:$0xff]  ;;  %v3982_v48 = vpack.c.bf16 %v98_v45, %v97_v44  ;;  %v4003_v50 = vld [vmem:[#allocation2] sm:$0xff] }
  0x42   :  { %3202 = vmatmul.mubr.f32.vlgmr.msra.gmra.mrb[0].mxu1 %v3828_v1  ;;  %3520 = vmatpush3.bf16.msra.mxu0 %v3928_v18  ;;  %v3986_v49 = vpack.c.bf16 %v79_v47, %v78_v46  ;;  %v4005_v51 = vld [vmem:[#allocation2 + $0x8] sm:$0xff]  ;;  %v4016_v53 = vld [vmem:[%s4275_s3] ss:$0 sm:$0xff]  ;;  %v4022_v61 = vld [vmem:[%s4275_s3 + $0x1] ss:$0 sm:$0xff] }
  0x43   :  { %3526 = vmatpush3.bf16.msra.mxu1 %v3932_v19  ;;  %3521 = vmatprep.subr.bf16.mxu0 %v3826_v0  ;;  %v4028_v8 = vld [vmem:[%s4275_s3 + $0x2] ss:$0 sm:$0xff]  ;;  %v4034_v22 = vld [vmem:[%s4275_s3 + $0x3] ss:$0 sm:$0xff]  ;;  %v3829_v47 = vmov 1966171168  }
  0x44   :  { %3527 = vmatprep.subr.bf16.mxu1 %v3826_v0  ;;  %3212 = vmatprep.mubr.msk.f32.mxu0 %vm3827_vm0, %v3828_v1  ;;  %s3830_s3 = smov 32  }
  0x45   :  { %3223 = vmatprep.mubr.msk.f32.mxu1 %vm3827_vm0, %v3828_v1 }
  0x46   :  { %3523 = vmatpush3.bf16.msra.mxu0 %v3938_v24 }
  0x47   :  { %3529 = vmatpush3.bf16.msra.mxu1 %v3942_v25  ;;  %3530 = vmatprep.subr.bf16.mxu0 %v3826_v0 }
  0x48   :  { %3536 = vmatprep.subr.bf16.mxu1 %v3826_v0 }
  0x49   :  { %3213 = vmatmul.mubr.f32.vlgmr.msra.gmra.mrb[2].mxu0 %v3828_v1 }
  0x4a   :  { %3224 = vmatmul.mubr.f32.vlgmr.msra.gmra.mrb[2].mxu1 %v3828_v1  ;;  %3532 = vmatpush3.bf16.msra.mxu0 %v3950_v30 }
  0x4b   :  { %3538 = vmatpush3.bf16.msra.mxu1 %v3954_v31  ;;  %3533 = vmatprep.subr.bf16.mxu0 %v3826_v0 }
  0x4c   :  { %3539 = vmatprep.subr.bf16.mxu1 %v3826_v0  ;;  %3234 = vmatprep.mubr.msk.f32.mxu0 %vm3827_vm0, %v3828_v1 }
  0x4d   :  { %3245 = vmatprep.mubr.msk.f32.mxu1 %vm3827_vm0, %v3828_v1 }
  0x4e   :  { %3535 = vmatpush3.bf16.msra.mxu0 %v3960_v36 }
  0x4f   :  { %3541 = vmatpush3.bf16.msra.mxu1 %v3964_v37  ;;  %3542 = vmatprep.subr.bf16.mxu0 %v3826_v0 }
  0x50   :  { %3548 = vmatprep.subr.bf16.mxu1 %v3826_v0 }
  0x51   :  { %3235 = vmatmul.mubr.f32.vlgmr.msra.gmra.mrb[4].mxu0 %v3828_v1 }
  0x52   :  { %3246 = vmatmul.mubr.f32.vlgmr.msra.gmra.mrb[4].mxu1 %v3828_v1  ;;  %3544 = vmatpush3.bf16.msra.mxu0 %v3972_v42 }
  0x53   :  { %3550 = vmatpush3.bf16.msra.mxu1 %v3976_v43  ;;  %3545 = vmatprep.subr.bf16.mxu0 %v3826_v0 }
  0x54   :  { %3551 = vmatprep.subr.bf16.mxu1 %v3826_v0  ;;  %3256 = vmatprep.mubr.msk.f32.mxu0 %vm3827_vm0, %v3828_v1 }
  0x55   :  { %3267 = vmatprep.mubr.msk.f32.mxu1 %vm3827_vm0, %v3828_v1 }
  0x56   :  { %3547 = vmatpush3.bf16.msra.mxu0 %v3982_v48 }
  0x57   :  { %3553 = vmatpush3.bf16.msra.mxu1 %v3986_v49  ;;  %3270 = vmatprep.subr.mxu0 %v3828_v1 }
  0x58   :  { %3275 = vmatprep.subr.mxu1 %v3828_v1 }
  0x59   :  { %3257 = vmatmul.mubr.f32.vlgmr.msra.gmra.mrb[6].mxu0 %v3828_v1 }
  0x5a   :  { %3268 = vmatmul.mubr.f32.vlgmr.msra.gmra.mrb[6].mxu1 %v3828_v1  ;;  %3272 = vmatprep.mubr.msk.f32.mxu0 %vm3827_vm0, %v3828_v1 }
  0x5b   :  { %3277 = vmatprep.mubr.msk.f32.mxu1 %vm3827_vm0, %v3828_v1 }
  0x5f   :  { %3271 = vmatpush3.xpose.msk.msra.mxu0 %vm130_vm1, %v4003_v50 }
  0x60   :  { %3276 = vmatpush3.xpose.msk.msra.mxu1 %vm130_vm1, %v4005_v51  ;;  %3280 = vmatprep.subr.mxu0 %v3828_v1 }
  0x61   :  { %3285 = vmatprep.subr.mxu1 %v3828_v1 }
 0x114   :  { %v200_v52 = vpop.f32.mrb[0].mxu0 }
 0x115   :  { %v270_v54 = vpop.f32.mrb[0].mxu1  ;;  %v3192_v55 = vpop.f32.mrb[1].mxu0 }
 0x116   :  { %v271_v56 = vadd.f32 %v270_v54, %v200_v52  ;;  %v3203_v57 = vpop.f32.mrb[1].mxu1  ;;  %v724_v52 = vunpack.c.l.s4 %v3829_v47  ;;  %v726_v54 = vlaneseq }
 0x118   :  { %v274_v58 = vadd.f32 %v4016_v53, %v271_v56  ;;  %v725_v55 = vunpack.c.0.s8 %v724_v52  ;;  %v727_v56 = vshrl.u32 %v726_v54, 7 }
 0x11a   :  { %v2995_v59 = vmul.f32 -1.442695, %v274_v58  ;;  %v4040_v58 = vsub.s32 %v725_v55, %v727_v56 }
 0x11c   :  { %3661 = vpow2.f32 %v2995_v59  ;;  %v347_v60 = vpop.f32.mrb[2].mxu0 }
 0x11d   :  { %v417_v62 = vpop.f32.mrb[2].mxu1  ;;  %v3214_v63 = vpop.f32.mrb[3].mxu0 }
 0x11e   :  { %v418_v2 = vadd.f32 %v417_v62, %v347_v60  ;;  %v3225_v3 = vpop.f32.mrb[3].mxu1 }
 0x120   :  { %v421_v4 = vadd.f32 %v4022_v61, %v418_v2 }
 0x122   :  { %v2996_v6 = vmul.f32 -1.442695, %v421_v4 }
 0x124   :  { %3663 = vpow2.f32 %v2996_v6  ;;  %v494_v7 = vpop.f32.mrb[4].mxu0 }
 0x125   :  { %v564_v10 = vpop.f32.mrb[4].mxu1  ;;  %v3236_v11 = vpop.f32.mrb[5].mxu0 }
 0x126   :  { %v3662_v14 = vpop.eup %3661  ;;  %v565_v15 = vadd.f32 %v564_v10, %v494_v7  ;;  %v3247_v16 = vpop.f32.mrb[5].mxu1 }
 0x127   :  { %v278_v17 = vadd.f32 1.0, %v3662_v14 }
 0x128   :  { %v568_v20 = vadd.f32 %v4028_v8, %v565_v15 }
 0x129   :  { %3665 = vrcp.f32 %v278_v17 }
 0x12a   :  { %3667 = vtanh.f32 %v568_v20 }
 0x12c   :  { %v636_v21 = vpop.f32.mrb[6].mxu0 }
 0x12d   :  { %v706_v23 = vpop.f32.mrb[6].mxu1  ;;  %v3258_v26 = vpop.f32.mrb[7].mxu0 }
 0x12e   :  { %v3664_v27 = vpop.eup %3663  ;;  %v707_v28 = vadd.f32 %v706_v23, %v636_v21  ;;  %v3269_v29 = vpop.f32.mrb[7].mxu1 }
 0x12f   :  { %v425_v32 = vadd.f32 1.0, %v3664_v27 }
 0x130   :  { %v710_v33 = vadd.f32 %v4034_v22, %v707_v28 }
 0x131   :  { %3669 = vrcp.f32 %v425_v32 }
 0x132   :  { %v2997_v34 = vmul.f32 -1.442695, %v710_v33 }
 0x133   :  { %v3666_v35 = vpop.eup %3665 }
 0x134   :  { %v3668_v38 = vpop.eup %3667  ;;  %3671 = vpow2.f32 %v2997_v34 }
 0x135   :  { %v718_v39 = vmul.f32 %v3668_v38, %v3666_v35 }
 0x13b   :  { %v3670_v40 = vpop.eup %3669 }
 0x13c   :  { %v717_v41 = vmul.f32 0.0, %v3670_v40 }
 0x13e   :  { %v3672_v44 = vpop.eup %3671  ;;  %v4037_v45 = vadd.f32 %v718_v39, %v717_v41 }
 0x13f   :  { %v714_v46 = vadd.f32 1.0, %v3672_v44 }
 0x140   :  { %3673 = vtanh.f32 %v4037_v45 }
 0x141   :  { %3675 = vrcp.f32 %v714_v46 }
 0x14a   :  { %v3674_v57 = vpop.eup %3673 }
 0x14b   :  { %v3676_v59 = vpop.eup %3675 }
 0x14c   :  { %v4042_v60 = vmul.f32 %v3676_v59, %v3674_v57 }
 0x14e   :  { %v729_v62 = vrot.slane %v4042_v60, %v4040_v58 }
 0x150   :  { %v737_v63 = vrot.slane %v729_v62, %v4040_v58  ;;  %v730_v2 = vcombine.high %v729_v62, %v729_v62 }
 0x152   :  { %3273 = vmatmul.mubr.msk.f32.vlgmr.msra.gmra.mrb[8].mxu0 %vm130_vm1, %v737_v63  ;;  %v744_v3 = vrot.slane %v730_v2, %v4040_v58 }
 0x153   :  { %3281 = vmatpush3.msra.mxu0 %v4003_v50  ;;  %3282 = vmatprep.mubr.msk.f32.mxu0 %vm3827_vm0, %v3828_v1 }
 0x154   :  { %3278 = vmatmul.mubr.msk.f32.vlgmr.msra.gmra.mrb[8].mxu1 %vm130_vm1, %v744_v3  ;;  %3554 = vmatprep.subr.bf16.mxu0 %v3826_v0 }
 0x155   :  { %3286 = vmatpush3.msra.mxu1 %v4005_v51  ;;  %3287 = vmatprep.mubr.msk.f32.mxu1 %vm3827_vm0, %v3828_v1 }
 0x156   :  { %3560 = vmatprep.subr.bf16.mxu1 %v3826_v0 }
 0x225   :  { %v816_v4 = vpop.f32.mrb[8].mxu0 }
 0x226   :  { %v3274_v6 = vpop.f32.mrb[9].mxu0 }
 0x227   :  { %v891_v7 = vpop.f32.mrb[8].mxu1 }
 0x228   :  { %v897_v10 = vrot.slane %v891_v7, 7  ;;  %v3279_v11 = vpop.f32.mrb[9].mxu1 }
 0x22a   :  { %v899_v14 = vsel %vm898_vm2, %v897_v10, %v816_v4 }
 0x22b   :  { %v902_v15 = vsel %vm901_vm3, %v899_v14, -inf }
 0x22c   :  { %903 = vmax.xlane.f32.xlu0 %v902_v15 }
 0x2b9   :  { %v904_v16 = vpop.xlane.xlu0 %903 }
 0x2ba   :  { %v906_v17 = vrot.slane %v904_v16, 1  ;;  %v909_v20 = vsub.f32 %v816_v4, %v904_v16 }
 0x2bc   :  { %v910_v21 = vsub.f32 %v891_v7, %v906_v17  ;;  %v911_v23 = vmul.f32 1.442695, %v909_v20 }
 0x2be   :  { %v913_v26 = vmul.f32 1.442695, %v910_v21 }
 0x2c0   :  { %3677 = vpow2.f32 %v913_v26 }
 0x2c1   :  { %3679 = vpow2.f32 %v911_v23 }
 0x2ca   :  { %v3678_v27 = vpop.eup %3677 }
 0x2cb   :  { %v917_v28 = vrot.slane %v3678_v27, 7  ;;  %v3680_v29 = vpop.eup %3679 }
 0x2cd   :  { %v918_v32 = vsel %vm898_vm2, %v917_v28, %v3680_v29 }
 0x2ce   :  { %v920_v33 = vsel %vm901_vm3, %v918_v32, 0.0 }
 0x2cf   :  { %921 = vadd.xlane.f32.xlu0 %v920_v33 }
 0x35c   :  { %v922_v34 = vpop.xlane.xlu0 %921 }
 0x35d   :  { %3681 = vrcp.f32 %v922_v34 }
 0x367   :  { %v3682_v35 = vpop.eup %3681 }
 0x368   :  { %v925_v38 = vrot.slane %v3682_v35, 1  ;;  %v928_v39 = vmul.f32 %v3682_v35, %v3680_v29 }
 0x36a   :  { %3283 = vmatmul.mubr.msk.f32.vlgmr.msra.gmra.mrb[10].mxu0 %vm930_vm4, %v928_v39  ;;  %v929_v40 = vmul.f32 %v3678_v27, %v925_v38 }
 0x36b   :  { %3556 = vmatpush3.bf16.msra.mxu0 %v3915_v5  ;;  %3298 = vmatprep.mubr.msk.f32.mxu0 %vm3827_vm0, %v3828_v1 }
 0x36c   :  { %3288 = vmatmul.mubr.msk.f32.vlgmr.msra.gmra.mrb[10].mxu1 %vm930_vm4, %v929_v40  ;;  %3557 = vmatprep.subr.bf16.mxu0 %v3826_v0 }
 0x36d   :  { %3562 = vmatpush3.bf16.msra.mxu1 %v3917_v9  ;;  %3309 = vmatprep.mubr.msk.f32.mxu1 %vm3827_vm0, %v3828_v1 }
 0x36e   :  { %3563 = vmatprep.subr.bf16.mxu1 %v3826_v0 }
 0x36f   :  { %3559 = vmatpush3.bf16.msra.mxu0 %v3920_v12 }
 0x370   :  { %3566 = vmatprep.subr.bf16.mxu0 %v3826_v0 }
 0x371   :  { %3565 = vmatpush3.bf16.msra.mxu1 %v3924_v13 }
 0x372   :  { %3572 = vmatprep.subr.bf16.mxu1 %v3826_v0 }
 0x374   :  { %3310 = vmatmul.mubr.msk.f32.vlgmr.msra.gmra.mrb[12].mxu1 %vm130_vm1, %v4042_v60 }
 0x375   :  { %3574 = vmatpush3.bf16.msra.mxu1 %v3932_v19  ;;  %3331 = vmatprep.mubr.msk.f32.mxu1 %vm3827_vm0, %v3828_v1 }
 0x376   :  { %3575 = vmatprep.subr.bf16.mxu1 %v3826_v0 }
 0x379   :  { %3577 = vmatpush3.bf16.msra.mxu1 %v3942_v25 }
 0x37a   :  { %3584 = vmatprep.subr.bf16.mxu1 %v3826_v0 }
 0x37c   :  { %3332 = vmatmul.mubr.msk.f32.vlgmr.msra.gmra.mrb[14].mxu1 %vm130_vm1, %v4042_v60 }
 0x37d   :  { %3586 = vmatpush3.bf16.msra.mxu1 %v3954_v31  ;;  %3353 = vmatprep.mubr.msk.f32.mxu1 %vm3827_vm0, %v3828_v1 }
 0x37e   :  { %3587 = vmatprep.subr.bf16.mxu1 %v3826_v0 }
 0x381   :  { %3589 = vmatpush3.bf16.msra.mxu1 %v3964_v37 }
 0x382   :  { %3596 = vmatprep.subr.bf16.mxu1 %v3826_v0 }
 0x384   :  { %3354 = vmatmul.mubr.msk.f32.vlgmr.msra.gmra.mrb[16].mxu1 %vm130_vm1, %v4042_v60 }
 0x385   :  { %3598 = vmatpush3.bf16.msra.mxu1 %v3976_v43  ;;  %3375 = vmatprep.mubr.msk.f32.mxu1 %vm3827_vm0, %v3828_v1 }
 0x386   :  { %3599 = vmatprep.subr.bf16.mxu1 %v3826_v0 }
 0x389   :  { %3601 = vmatpush3.bf16.msra.mxu1 %v3986_v49 }
 0x38a   :  { %3383 = vmatprep.subr.mxu1 %v3828_v1 }
 0x38c   :  { %3376 = vmatmul.mubr.msk.f32.vlgmr.msra.gmra.mrb[18].mxu1 %vm130_vm1, %v4042_v60 }
 0x38d   :  { %3385 = vmatprep.mubr.msk.f32.mxu1 %vm3827_vm0, %v3828_v1 }
 0x392   :  { %3384 = vmatpush3.xpose.msk.msra.mxu1 %vm130_vm1, %v4005_v51 }
 0x393   :  { %3393 = vmatprep.subr.mxu1 %v3828_v1 }
 0x43d   :  { %v1000_v41 = vpop.f32.mrb[10].mxu0 }
 0x43e   :  { %v3284_v44 = vpop.f32.mrb[11].mxu0 }
 0x43f   :  { %v1073_v46 = vpop.f32.mrb[10].mxu1 }
 0x440   :  { %v1079_v47 = vrot.slane %v1073_v46, 7  ;;  %v3289_v52 = vpop.f32.mrb[11].mxu1 }
 0x442   :  { %v1080_v54 = vsel %vm898_vm2, %v1079_v47, %v1000_v41 }
 0x443   :  { %3299 = vmatmul.mubr.msk.f32.vlgmr.msra.gmra.mrb[12].mxu0 %vm130_vm1, %v1080_v54 }
 0x444   :  { %3568 = vmatpush3.bf16.msra.mxu0 %v3928_v18  ;;  %3320 = vmatprep.mubr.msk.f32.mxu0 %vm3827_vm0, %v3828_v1 }
 0x445   :  { %3569 = vmatprep.subr.bf16.mxu0 %v3826_v0 }
 0x447   :  { %v1221_v55 = vpop.f32.mrb[12].mxu1 }
 0x448   :  { %v3311_v56 = vpop.f32.mrb[13].mxu1  ;;  %3571 = vmatpush3.bf16.msra.mxu0 %v3938_v24 }
 0x449   :  { %3578 = vmatprep.subr.bf16.mxu0 %v3826_v0 }
 0x44b   :  { %3321 = vmatmul.mubr.msk.f32.vlgmr.msra.gmra.mrb[14].mxu0 %vm130_vm1, %v1080_v54 }
 0x44c   :  { %3580 = vmatpush3.bf16.msra.mxu0 %v3950_v30  ;;  %3342 = vmatprep.mubr.msk.f32.mxu0 %vm3827_vm0, %v3828_v1 }
 0x44d   :  { %3581 = vmatprep.subr.bf16.mxu0 %v3826_v0 }
 0x44f   :  { %v1368_v57 = vpop.f32.mrb[14].mxu1 }
 0x450   :  { %v3333_v59 = vpop.f32.mrb[15].mxu1  ;;  %3583 = vmatpush3.bf16.msra.mxu0 %v3960_v36 }
 0x451   :  { %3590 = vmatprep.subr.bf16.mxu0 %v3826_v0 }
 0x453   :  { %3343 = vmatmul.mubr.msk.f32.vlgmr.msra.gmra.mrb[16].mxu0 %vm130_vm1, %v1080_v54 }
 0x454   :  { %3592 = vmatpush3.bf16.msra.mxu0 %v3972_v42  ;;  %3364 = vmatprep.mubr.msk.f32.mxu0 %vm3827_vm0, %v3828_v1 }
 0x455   :  { %3593 = vmatprep.subr.bf16.mxu0 %v3826_v0 }
 0x457   :  { %v1515_v60 = vpop.f32.mrb[16].mxu1 }
 0x458   :  { %v3355_v62 = vpop.f32.mrb[17].mxu1  ;;  %3595 = vmatpush3.bf16.msra.mxu0 %v3982_v48 }
 0x459   :  { %3378 = vmatprep.subr.mxu0 %v3828_v1 }
 0x45b   :  { %3365 = vmatmul.mubr.msk.f32.vlgmr.msra.gmra.mrb[18].mxu0 %vm130_vm1, %v1080_v54 }
 0x45c   :  { %3380 = vmatprep.mubr.msk.f32.mxu0 %vm3827_vm0, %v3828_v1 }
 0x45f   :  { %v1657_v63 = vpop.f32.mrb[18].mxu1 }
 0x460   :  { %v3377_v2 = vpop.f32.mrb[19].mxu1 }
 0x461   :  { %3379 = vmatpush3.xpose.msk.msra.mxu0 %vm130_vm1, %v4003_v50 }
 0x462   :  { %3388 = vmatprep.subr.mxu0 %v3828_v1 }
 0x516   :  { %v1149_v3 = vpop.f32.mrb[12].mxu0 }
 0x517   :  { %v1222_v4 = vadd.f32 %v1221_v55, %v1149_v3  ;;  %v3300_v6 = vpop.f32.mrb[13].mxu0 }
 0x519   :  { %v1225_v7 = vadd.f32 %v4016_v53, %v1222_v4 }
 0x51b   :  { %v3006_v10 = vmul.f32 -1.442695, %v1225_v7 }
 0x51d   :  { %3683 = vpow2.f32 %v3006_v10 }
 0x51e   :  { %v1298_v11 = vpop.f32.mrb[14].mxu0 }
 0x51f   :  { %v1369_v14 = vadd.f32 %v1368_v57, %v1298_v11  ;;  %v3322_v15 = vpop.f32.mrb[15].mxu0 }
 0x521   :  { %v1372_v16 = vadd.f32 %v4022_v61, %v1369_v14 }
 0x523   :  { %v3009_v17 = vmul.f32 -1.442695, %v1372_v16 }
 0x525   :  { %3685 = vpow2.f32 %v3009_v17 }
 0x526   :  { %v1445_v20 = vpop.f32.mrb[16].mxu0 }
 0x527   :  { %v3684_v21 = vpop.eup %3683  ;;  %v1516_v23 = vadd.f32 %v1515_v60, %v1445_v20  ;;  %v3344_v26 = vpop.f32.mrb[17].mxu0 }
 0x528   :  { %v1229_v27 = vadd.f32 1.0, %v3684_v21 }
 0x529   :  { %v1519_v28 = vadd.f32 %v4028_v8, %v1516_v23 }
 0x52a   :  { %3687 = vrcp.f32 %v1229_v27 }
 0x52b   :  { %3689 = vtanh.f32 %v1519_v28 }
 0x52e   :  { %v1587_v29 = vpop.f32.mrb[18].mxu0 }
 0x52f   :  { %v3686_v32 = vpop.eup %3685  ;;  %v1658_v33 = vadd.f32 %v1657_v63, %v1587_v29  ;;  %v3366_v34 = vpop.f32.mrb[19].mxu0 }
 0x530   :  { %v1376_v35 = vadd.f32 1.0, %v3686_v32 }
 0x531   :  { %v1661_v38 = vadd.f32 %v4034_v22, %v1658_v33 }
 0x532   :  { %3691 = vrcp.f32 %v1376_v35 }
 0x533   :  { %v3014_v39 = vmul.f32 -1.442695, %v1661_v38 }
 0x534   :  { %v3688_v40 = vpop.eup %3687 }
 0x535   :  { %v3690_v41 = vpop.eup %3689  ;;  %3693 = vpow2.f32 %v3014_v39 }
 0x536   :  { %v1669_v44 = vmul.f32 %v3690_v41, %v3688_v40 }
 0x53c   :  { %v3692_v46 = vpop.eup %3691 }
 0x53d   :  { %v1668_v47 = vmul.f32 %v3692_v46, %v4037_v45 }
 0x53f   :  { %v3694_v52 = vpop.eup %3693  ;;  %v4140_v54 = vadd.f32 %v1669_v44, %v1668_v47 }
 0x540   :  { %v1665_v55 = vadd.f32 1.0, %v3694_v52 }
 0x541   :  { %3695 = vtanh.f32 %v4140_v54 }
 0x542   :  { %3697 = vrcp.f32 %v1665_v55 }
 0x54b   :  { %v3696_v56 = vpop.eup %3695 }
 0x54c   :  { %v3698_v57 = vpop.eup %3697 }
 0x54d   :  { %v4143_v59 = vmul.f32 %v3698_v57, %v3696_v56 }
 0x54f   :  { %v1680_v60 = vrot.slane %v4143_v59, %v4040_v58 }
 0x551   :  { %v1688_v62 = vrot.slane %v1680_v60, %v4040_v58  ;;  %v1681_v63 = vcombine.high %v1680_v60, %v1680_v60 }
 0x553   :  { %3381 = vmatmul.mubr.msk.f32.vlgmr.msra.gmra.mrb[20].mxu0 %vm130_vm1, %v1688_v62  ;;  %v1695_v45 = vrot.slane %v1681_v63, %v4040_v58 }
 0x554   :  { %3389 = vmatpush3.msra.mxu0 %v4003_v50  ;;  %3390 = vmatprep.mubr.msk.f32.mxu0 %vm3827_vm0, %v3828_v1 }
 0x555   :  { %3386 = vmatmul.mubr.msk.f32.vlgmr.msra.gmra.mrb[20].mxu1 %vm130_vm1, %v1695_v45  ;;  %3602 = vmatprep.subr.bf16.mxu0 %v3826_v0 }
 0x556   :  { %3394 = vmatpush3.msra.mxu1 %v4005_v51  ;;  %3395 = vmatprep.mubr.msk.f32.mxu1 %vm3827_vm0, %v3828_v1 }
 0x557   :  { %3608 = vmatprep.subr.bf16.mxu1 %v3826_v0 }
 0x626   :  { %v1764_v2 = vpop.f32.mrb[20].mxu0 }
 0x627   :  { %v3382_v3 = vpop.f32.mrb[21].mxu0 }
 0x628   :  { %v1836_v4 = vpop.f32.mrb[20].mxu1 }
 0x629   :  { %v1842_v6 = vrot.slane %v1836_v4, 7  ;;  %v3387_v7 = vpop.f32.mrb[21].mxu1 }
 0x62b   :  { %v1843_v10 = vsel %vm898_vm2, %v1842_v6, %v1764_v2 }
 0x62c   :  { %v1845_v11 = vsel %vm901_vm3, %v1843_v10, -inf }
 0x62d   :  { %1846 = vmax.xlane.f32.xlu1 %v1845_v11 }
 0x6ba   :  { %v1847_v14 = vpop.xlane.xlu1 %1846 }
 0x6bb   :  { %v1849_v15 = vrot.slane %v1847_v14, 1  ;;  %v1852_v16 = vsub.f32 %v1764_v2, %v1847_v14 }
 0x6bd   :  { %v1853_v17 = vsub.f32 %v1836_v4, %v1849_v15  ;;  %v1854_v20 = vmul.f32 1.442695, %v1852_v16 }
 0x6bf   :  { %v1856_v21 = vmul.f32 1.442695, %v1853_v17 }
 0x6c1   :  { %3699 = vpow2.f32 %v1856_v21 }
 0x6c2   :  { %3701 = vpow2.f32 %v1854_v20 }
 0x6cb   :  { %v3700_v23 = vpop.eup %3699 }
 0x6cc   :  { %v1860_v26 = vrot.slane %v3700_v23, 7  ;;  %v3702_v27 = vpop.eup %3701 }
 0x6ce   :  { %v1861_v28 = vsel %vm898_vm2, %v1860_v26, %v3702_v27 }
 0x6cf   :  { %v1863_v29 = vsel %vm901_vm3, %v1861_v28, 0.0 }
 0x6d0   :  { %1864 = vadd.xlane.f32.xlu1 %v1863_v29 }
 0x75d   :  { %v1865_v32 = vpop.xlane.xlu1 %1864 }
 0x75e   :  { %3703 = vrcp.f32 %v1865_v32 }
 0x768   :  { %v3704_v33 = vpop.eup %3703 }
 0x769   :  { %v1868_v34 = vrot.slane %v3704_v33, 1  ;;  %v1871_v35 = vmul.f32 %v3704_v33, %v3702_v27 }
 0x76b   :  { %3391 = vmatmul.mubr.msk.f32.vlgmr.msra.gmra.mrb[22].mxu0 %vm930_vm4, %v1871_v35  ;;  %v1872_v38 = vmul.f32 %v3700_v23, %v1868_v34 }
 0x76c   :  { %3604 = vmatpush3.bf16.msra.mxu0 %v3915_v5  ;;  %3406 = vmatprep.mubr.msk.f32.mxu0 %vm3827_vm0, %v3828_v1 }
 0x76d   :  { %3396 = vmatmul.mubr.msk.f32.vlgmr.msra.gmra.mrb[22].mxu1 %vm930_vm4, %v1872_v38  ;;  %3605 = vmatprep.subr.bf16.mxu0 %v3826_v0 }
 0x76e   :  { %3610 = vmatpush3.bf16.msra.mxu1 %v3917_v9  ;;  %3417 = vmatprep.mubr.msk.f32.mxu1 %vm3827_vm0, %v3828_v1 }
 0x76f   :  { %3611 = vmatprep.subr.bf16.mxu1 %v3826_v0 }
 0x770   :  { %3607 = vmatpush3.bf16.msra.mxu0 %v3920_v12 }
 0x771   :  { %3614 = vmatprep.subr.bf16.mxu0 %v3826_v0 }
 0x772   :  { %3613 = vmatpush3.bf16.msra.mxu1 %v3924_v13 }
 0x773   :  { %3620 = vmatprep.subr.bf16.mxu1 %v3826_v0 }
 0x775   :  { %3418 = vmatmul.mubr.msk.f32.vlgmr.msra.gmra.mrb[24].mxu1 %vm130_vm1, %v4143_v59 }
 0x776   :  { %3622 = vmatpush3.bf16.msra.mxu1 %v3932_v19  ;;  %3439 = vmatprep.mubr.msk.f32.mxu1 %vm3827_vm0, %v3828_v1 }
 0x777   :  { %3623 = vmatprep.subr.bf16.mxu1 %v3826_v0 }
 0x77a   :  { %3625 = vmatpush3.bf16.msra.mxu1 %v3942_v25 }
 0x77b   :  { %3632 = vmatprep.subr.bf16.mxu1 %v3826_v0 }
 0x77d   :  { %3440 = vmatmul.mubr.msk.f32.vlgmr.msra.gmra.mrb[26].mxu1 %vm130_vm1, %v4143_v59 }
 0x77e   :  { %3634 = vmatpush3.bf16.msra.mxu1 %v3954_v31  ;;  %3461 = vmatprep.mubr.msk.f32.mxu1 %vm3827_vm0, %v3828_v1 }
 0x77f   :  { %3635 = vmatprep.subr.bf16.mxu1 %v3826_v0 }
 0x782   :  { %3637 = vmatpush3.bf16.msra.mxu1 %v3964_v37 }
 0x783   :  { %3644 = vmatprep.subr.bf16.mxu1 %v3826_v0 }
 0x785   :  { %3462 = vmatmul.mubr.msk.f32.vlgmr.msra.gmra.mrb[28].mxu1 %vm130_vm1, %v4143_v59 }
 0x786   :  { %3646 = vmatpush3.bf16.msra.mxu1 %v3976_v43  ;;  %3483 = vmatprep.mubr.msk.f32.mxu1 %vm3827_vm0, %v3828_v1 }
 0x787   :  { %3647 = vmatprep.subr.bf16.mxu1 %v3826_v0 }
 0x78a   :  { %3649 = vmatpush3.bf16.msra.mxu1 %v3986_v49 }
 0x78b   :  { %3491 = vmatprep.subr.mxu1 %v3828_v1 }
 0x78d   :  { %3484 = vmatmul.mubr.msk.f32.vlgmr.msra.gmra.mrb[30].mxu1 %vm130_vm1, %v4143_v59 }
 0x78e   :  { %3493 = vmatprep.mubr.msk.f32.mxu1 %vm3827_vm0, %v3828_v1 }
 0x793   :  { %3492 = vmatpush3.xpose.msk.msra.mxu1 %vm130_vm1, %v4005_v51 }
 0x794   :  { %3501 = vmatprep.subr.mxu1 %v3828_v1 }
 0x83e   :  { %v1942_v5 = vpop.f32.mrb[22].mxu0 }
 0x83f   :  { %v3392_v9 = vpop.f32.mrb[23].mxu0 }
 0x840   :  { %v2015_v12 = vpop.f32.mrb[22].mxu1 }
 0x841   :  { %v2021_v13 = vrot.slane %v2015_v12, 7  ;;  %v3397_v19 = vpop.f32.mrb[23].mxu1 }
 0x843   :  { %v2022_v25 = vsel %vm898_vm2, %v2021_v13, %v1942_v5 }
 0x844   :  { %3407 = vmatmul.mubr.msk.f32.vlgmr.msra.gmra.mrb[24].mxu0 %vm130_vm1, %v2022_v25 }
 0x845   :  { %3616 = vmatpush3.bf16.msra.mxu0 %v3928_v18  ;;  %3428 = vmatprep.mubr.msk.f32.mxu0 %vm3827_vm0, %v3828_v1 }
 0x846   :  { %3617 = vmatprep.subr.bf16.mxu0 %v3826_v0 }
 0x848   :  { %v2163_v31 = vpop.f32.mrb[24].mxu1 }
 0x849   :  { %v3419_v37 = vpop.f32.mrb[25].mxu1  ;;  %3619 = vmatpush3.bf16.msra.mxu0 %v3938_v24 }
 0x84a   :  { %3626 = vmatprep.subr.bf16.mxu0 %v3826_v0 }
 0x84c   :  { %3429 = vmatmul.mubr.msk.f32.vlgmr.msra.gmra.mrb[26].mxu0 %vm130_vm1, %v2022_v25 }
 0x84d   :  { %3628 = vmatpush3.bf16.msra.mxu0 %v3950_v30  ;;  %3450 = vmatprep.mubr.msk.f32.mxu0 %vm3827_vm0, %v3828_v1 }
 0x84e   :  { %3629 = vmatprep.subr.bf16.mxu0 %v3826_v0 }
 0x850   :  { %v2310_v18 = vpop.f32.mrb[26].mxu1 }
 0x851   :  { %v3441_v43 = vpop.f32.mrb[27].mxu1  ;;  %3631 = vmatpush3.bf16.msra.mxu0 %v3960_v36 }
 0x852   :  { %3638 = vmatprep.subr.bf16.mxu0 %v3826_v0 }
 0x854   :  { %3451 = vmatmul.mubr.msk.f32.vlgmr.msra.gmra.mrb[28].mxu0 %vm130_vm1, %v2022_v25 }
 0x855   :  { %3640 = vmatpush3.bf16.msra.mxu0 %v3972_v42  ;;  %3472 = vmatprep.mubr.msk.f32.mxu0 %vm3827_vm0, %v3828_v1 }
 0x856   :  { %3641 = vmatprep.subr.bf16.mxu0 %v3826_v0 }
 0x858   :  { %v2457_v24 = vpop.f32.mrb[28].mxu1 }
 0x859   :  { %v3463_v30 = vpop.f32.mrb[29].mxu1  ;;  %3643 = vmatpush3.bf16.msra.mxu0 %v3982_v48 }
 0x85a   :  { %3486 = vmatprep.subr.mxu0 %v3828_v1 }
 0x85c   :  { %3473 = vmatmul.mubr.msk.f32.vlgmr.msra.gmra.mrb[30].mxu0 %vm130_vm1, %v2022_v25 }
 0x85d   :  { %3488 = vmatprep.mubr.msk.f32.mxu0 %vm3827_vm0, %v3828_v1 }
 0x860   :  { %v2599_v36 = vpop.f32.mrb[30].mxu1 }
 0x861   :  { %v3485_v49 = vpop.f32.mrb[31].mxu1 }
 0x862   :  { %3487 = vmatpush3.xpose.msk.msra.mxu0 %vm130_vm1, %v4003_v50 }
 0x863   :  { %3496 = vmatprep.subr.mxu0 %v3828_v1 }
 0x917   :  { %v2091_v42 = vpop.f32.mrb[24].mxu0 }
 0x918   :  { %v2164_v0 = vadd.f32 %v2163_v31, %v2091_v42  ;;  %v3408_v39 = vpop.f32.mrb[25].mxu0 }
 0x91a   :  { %v2167_v40 = vadd.f32 %v4016_v53, %v2164_v0 }
 0x91c   :  { %v3023_v48 = vmul.f32 -1.442695, %v2167_v40 }
 0x91e   :  { %3705 = vpow2.f32 %v3023_v48 }
 0x91f   :  { %v2240_v41 = vpop.f32.mrb[26].mxu0 }
 0x920   :  { %v2311_v44 = vadd.f32 %v2310_v18, %v2240_v41  ;;  %v3430_v46 = vpop.f32.mrb[27].mxu0 }
 0x922   :  { %v2314_v47 = vadd.f32 %v4022_v61, %v2311_v44 }
 0x924   :  { %v3026_v52 = vmul.f32 -1.442695, %v2314_v47 }
 0x926   :  { %3707 = vpow2.f32 %v3026_v52 }
 0x927   :  { %v2387_v55 = vpop.f32.mrb[28].mxu0 }
 0x928   :  { %v3706_v56 = vpop.eup %3705  ;;  %v2458_v57 = vadd.f32 %v2457_v24, %v2387_v55  ;;  %v3452_v59 = vpop.f32.mrb[29].mxu0 }
 0x929   :  { %v2171_v60 = vadd.f32 1.0, %v3706_v56 }
 0x92a   :  { %v2461_v62 = vadd.f32 %v4028_v8, %v2458_v57 }
 0x92b   :  { %3709 = vrcp.f32 %v2171_v60 }
 0x92c   :  { %3711 = vtanh.f32 %v2461_v62 }
 0x92f   :  { %v2529_v63 = vpop.f32.mrb[30].mxu0 }
 0x930   :  { %v3708_v53 = vpop.eup %3707  ;;  %v2600_v45 = vadd.f32 %v2599_v36, %v2529_v63  ;;  %v3474_v2 = vpop.f32.mrb[31].mxu0 }
 0x931   :  { %v2318_v3 = vadd.f32 1.0, %v3708_v53 }
 0x932   :  { %v2603_v4 = vadd.f32 %v4034_v22, %v2600_v45 }
 0x933   :  { %3713 = vrcp.f32 %v2318_v3 }
 0x934   :  { %v3031_v61 = vmul.f32 -1.442695, %v2603_v4 }
 0x935   :  { %v3710_v6 = vpop.eup %3709 }
 0x936   :  { %v3712_v7 = vpop.eup %3711  ;;  %3715 = vpow2.f32 %v3031_v61 }
 0x937   :  { %v2611_v10 = vmul.f32 %v3712_v7, %v3710_v6 }
 0x93d   :  { %v3714_v11 = vpop.eup %3713 }
 0x93e   :  { %v2610_v14 = vmul.f32 %v3714_v11, %v4140_v54 }
 0x940   :  { %v3716_v15 = vpop.eup %3715  ;;  %v2612_v8 = vadd.f32 %v2611_v10, %v2610_v14 }
 0x941   :  { %v2607_v16 = vadd.f32 1.0, %v3716_v15 }
 0x942   :  { %3717 = vtanh.f32 %v2612_v8 }
 0x943   :  { %3719 = vrcp.f32 %v2607_v16 }
 0x94c   :  { %v3718_v17 = vpop.eup %3717 }
 0x94d   :  { %v3720_v20 = vpop.eup %3719 }
 0x94e   :  { %v2614_v21 = vmul.f32 %v3720_v20, %v3718_v17 }
 0x950   :  { %v2622_v23 = vrot.slane %v2614_v21, %v4040_v58 }
 0x952   :  { %v2630_v22 = vrot.slane %v2622_v23, %v4040_v58  ;;  %v2623_v26 = vcombine.high %v2622_v23, %v2622_v23 }
 0x954   :  { %3489 = vmatmul.mubr.msk.f32.vlgmr.msra.gmra.mrb[32].mxu0 %vm130_vm1, %v2630_v22  ;;  %v2637_v27 = vrot.slane %v2623_v26, %v4040_v58 }
 0x955   :  { %3497 = vmatpush3.msra.mxu0 %v4003_v50  ;;  %3498 = vmatprep.mubr.msk.f32.mxu0 %vm3827_vm0, %v3828_v1 }
 0x956   :  { %3494 = vmatmul.mubr.msk.f32.vlgmr.msra.gmra.mrb[32].mxu1 %vm130_vm1, %v2637_v27 }
 0x957   :  { %3502 = vmatpush3.msra.mxu1 %v4005_v51  ;;  %3503 = vmatprep.mubr.msk.f32.mxu1 %vm3827_vm0, %v3828_v1 }
 0xa27   :  { %v2706_v54 = vpop.f32.mrb[32].mxu0 }
 0xa28   :  { %v3490_v28 = vpop.f32.mrb[33].mxu0 }
 0xa29   :  { %v2778_v29 = vpop.f32.mrb[32].mxu1 }
 0xa2a   :  { %v2784_v32 = vrot.slane %v2778_v29, 7  ;;  %v3495_v33 = vpop.f32.mrb[33].mxu1 }
 0xa2c   :  { %v2785_v34 = vsel %vm898_vm2, %v2784_v32, %v2706_v54 }
 0xa2d   :  { %v2787_v58 = vsel %vm901_vm3, %v2785_v34, -inf }
 0xa2e   :  { %2788 = vmax.xlane.f32.xlu0 %v2787_v58 }
 0xabb   :  { %v2789_v50 = vpop.xlane.xlu0 %2788 }
 0xabc   :  { %v2791_v35 = vrot.slane %v2789_v50, 1  ;;  %v2794_v38 = vsub.f32 %v2706_v54, %v2789_v50 }
 0xabe   :  { %v2795_v5 = vsub.f32 %v2778_v29, %v2791_v35  ;;  %v2796_v9 = vmul.f32 1.442695, %v2794_v38 }
 0xac0   :  { %v2798_v12 = vmul.f32 1.442695, %v2795_v5 }
 0xac2   :  { %3721 = vpow2.f32 %v2798_v12 }
 0xac3   :  { %3723 = vpow2.f32 %v2796_v9 }
 0xacc   :  { %v3722_v51 = vpop.eup %3721 }
 0xacd   :  { %v2802_v1 = vrot.slane %v3722_v51, 7  ;;  %v3724_v13 = vpop.eup %3723 }
 0xacf   :  { %v2803_v19 = vsel %vm898_vm2, %v2802_v1, %v3724_v13 }
 0xad0   :  { %v2805_v25 = vsel %vm901_vm3, %v2803_v19, 0.0 }
 0xad1   :  { %2806 = vadd.xlane.f32.xlu1 %v2805_v25 }
 0xb5e   :  { %v2807_v31 = vpop.xlane.xlu1 %2806 }
 0xb5f   :  { %3725 = vrcp.f32 %v2807_v31 }
 0xb69   :  { %v3726_v37 = vpop.eup %3725 }
 0xb6a   :  { %v2810_v18 = vrot.slane %v3726_v37, 1  ;;  %v2813_v43 = vmul.f32 %v3726_v37, %v3724_v13 }
 0xb6c   :  { %3499 = vmatmul.mubr.msk.f32.vlgmr.msra.gmra.mrb[34].mxu0 %vm930_vm4, %v2813_v43  ;;  %v2814_v24 = vmul.f32 %v3722_v51, %v2810_v18 }
 0xb6e   :  { %3504 = vmatmul.mubr.msk.f32.vlgmr.msra.gmra.mrb[34].mxu1 %vm930_vm4, %v2814_v24 }
 0xc3f   :  { %v2884_v30 = vpop.f32.mrb[34].mxu0 }
 0xc40   :  { %v3500_v36 = vpop.f32.mrb[35].mxu0 }
 0xc41   :  { %v2957_v49 = vpop.f32.mrb[34].mxu1 }
 0xc42   :  { %v2963_v42 = vrot.slane %v2957_v49, 7  ;;  %v3505_v0 = vpop.f32.mrb[35].mxu1 }
 0xc44   :  { %v2964_v39 = vsel %vm898_vm2, %v2963_v42, %v2884_v30 }
 0xc45   :  { %2965 = vrot.lane.b32.xlu0 %v2964_v39, %s3830_s3 }
 0xcb7   :  { %v2966_v40 = vpop.permute.xlu0 %2965 }
 0xcb8   :  { %v2968_v48 = vsel %vm130_vm1, %v2614_v21, %v2966_v40 }
 0xcb9   :  { %v2970_v41 = vsel %vm2969_vm5, %v2968_v48, 0.0 }
 0xcba   :  { %2971 = vst [vmem:[#allocation8] sm:$0x3] %v2970_v41 }
 0xcbb   :  { %3804 = shalt.err (!%p3801_p0)
}
 0xcbc   :  { %s3805_s11 = scalar_lea.hbm %s4276_s4, 32 }
 0xcbd   :  { %p3806_p1 = scmp.ne.s32.totalorder %s4276_s4, %s3805_s11  ;;  %p3809_p2 = scmp.lt.u32.totalorder %s3805_s11, %s4276_s4 }
 0xcbf   :  { %p3811_p3 = pnand %p3809_p2, %p3806_p1 }
 0xcc1   :  { %3814 = shalt.err (!%p3811_p3)
}
 0xcc2   :  { %2981 = dma.vmem_to_hbm [thread:$0]  %s2979_s7, 32, %s4276_s4, [#allocation4]  }
 0xcc3   :  { %3819 = dma.done.wait [#allocation4], 32  }
 0xcc4   :  { %3820 = vsyncadd [#allocation4], 4294967264 }
 0xcc5   :  { %2985 = vsyncpa [#allocation3], 1 }
 0xcc6   :  { %2986 = vsyncpa [#allocation6], 1 }
 0xcc7   :  { %2987 = vsyncpa [#allocation4], 1 }

</bundles_post_ra>
